<compile_context>
chip_gen: v7x
topology: tpu7x:2x2x1
jax: 0.10.0
libtpu: 0.0.40
codegen_flags: <defaults>
</compile_context>

<pallas_src>
import functools

import jax
import jax.numpy as jnp
from jax.experimental import pallas as pl
from jax.experimental.pallas import tpu as pltpu

KSIZE = 3  # kernel_size = 3, stride = 1, padding = 1


def _dwconv_kernel(x_mid_ref, x_prev_ref, x_next_ref, w_ref, b_ref, o_ref, acc_ref,
                   *, C):
    """One (batch, H-tile) step of the depthwise 3-D conv in fused-lane layout.

    x_mid_ref : (TH, W, L)  current rows of the volume, L = D*C lane-fused
    x_prev_ref: (1,  W, L)  row just above the tile (clamped duplicate on top tile)
    x_next_ref: (1,  W, L)  row just below the tile (clamped duplicate on bottom tile)
    w_ref     : (27, L)     f32 weights, lane-fused over (D, C), zero-masked at the D
                            boundaries; row index = (kh*3 + kw)*3 + kd
    b_ref     : (1, L)      f32 bias, lane-fused (tiled D times)
    o_ref     : (TH, W, L)  output tile
    acc_ref   : (TH, W, L)  f32 scratch accumulator
    """
    TH, W, L = o_ref.shape

    ht = pl.program_id(1)
    nh = pl.num_programs(1)
    # Zero the halo-row contribution on boundary tiles (replaces host-side padding).
    gate_top = jnp.where(ht > 0, 1.0, 0.0).astype(jnp.float32)
    gate_bot = jnp.where(ht < nh - 1, 1.0, 0.0).astype(jnp.float32)

    wf = w_ref[...]       # (27, L), already f32 -- single hoisted load
    bias = b_ref[...]     # (1, L),  already f32

    def rolled(v):
        # kd = 0/1/2 <-> tap at d-1 / d / d+1.  A rotation of the fused lane axis by
        # +C / -C (taken mod L, XLU op) implements the D shift; the lanes that wrap
        # around are multiplied by the zeros baked into the fused weights, which is
        # exactly padding=1 along D.
        ax = v.ndim - 1
        return (pltpu.roll(v, C % L, ax), v, pltpu.roll(v, (L - C) % L, ax))

    xm = rolled(x_mid_ref[...])   # input dtype preserved end-to-end (bf16 friendly)
    xp = rolled(x_prev_ref[...])
    xn = rolled(x_next_ref[...])

    def taps(xs, kh, kw):
        # Sum over kd of (lane weight) * (lane-shifted input); promotes to f32.
        base = (kh * KSIZE + kw) * KSIZE
        t = wf[base:base + 1, :] * xs[0] + wf[base + 1:base + 2, :] * xs[1]
        return (t + wf[base + 2:base + 3, :] * xs[2]).astype(jnp.float32)

    # Bias init.  The accumulator lives in VMEM scratch so the H/W halo taps can be
    # accumulated into static sub-windows (no scatter ops, no host pad).
    acc_ref[...] = jnp.broadcast_to(bias, acc_ref.shape)

    for kw in range(KSIZE):
        dw = kw - 1
        ow = slice(max(0, -dw), W - max(0, dw))   # output columns hit by this tap
        iw = slice(max(0, dw), W - max(0, -dw))   # matching input columns
        # kh = 1: same row.
        acc_ref[:, ow, :] += taps(xm, 1, kw)[:, iw, :]
        # kh = 0: row above.  First output row of the tile reads the prev-halo row.
        pm = taps(xm, 0, kw)
        acc_ref[0:1, ow, :] += gate_top * taps(xp, 0, kw)[:, iw, :]
        acc_ref[1:TH, ow, :] += pm[0:TH - 1, iw, :]
        # kh = 2: row below.  Last output row of the tile reads the next-halo row.
        pp = taps(xm, 2, kw)
        acc_ref[0:TH - 1, ow, :] += pp[1:TH, iw, :]
        acc_ref[TH - 1:TH, ow, :] += gate_bot * taps(xn, 2, kw)[:, iw, :]

    # Lane-dense unmasked stores (last dim is D*C; a multiple of 128 in the demo).
    o_ref[...] = acc_ref[...].astype(o_ref.dtype)


def _pick_h_tile(H):
    # Prefer >= 2 grid steps along H (pipelining / megacore) with tiles of >= 2 rows.
    for t in (16, 8, 4, 2):
        if H % t == 0 and H // t >= 2:
            return t
    return H


@functools.partial(jax.jit, static_argnames=("H", "W", "D", "h_tile"))
def dwconv_pallas(x, w, b, *, H, W, D, h_tile=None):
    """Depthwise Conv3d(k=3, s=1, p=1, groups=C) on x laid out as (B, N, C).

    x: (B, N, C) with N == H*W*D.
    w: (3, 3, 3, C) -- PyTorch's depthwise Conv3d weight (C, 1, 3, 3, 3) transposed to
       spatial-major, channels-last.
    b: (C,).
    Returns (B, N, C).
    """
    B, N, C = x.shape
    assert N == H * W * D, "N must equal H*W*D"
    assert H >= 2 and W >= 2, "halo windows assume at least 2 rows/cols"
    L = D * C

    if h_tile is None:
        h_tile = _pick_h_tile(H)
    TH = h_tile
    assert TH >= 2 and H % TH == 0
    nh = H // TH

    # Exact relayout of PyTorch's (B, C, H, W, D) volume read back channels-last, with
    # (D, C) fused into one lane-dense axis:  (B, N, C) -> (B, H, W, D*C).
    x4 = x.reshape(B, H, W, L)

    # Fuse the depthwise weights over (D, C) and fold the D-boundary zero padding into
    # them: lane l = d*C + c of tap kd carries w[kh,kw,kd,c] iff 0 <= d + (kd-1) < D.
    dpos = jnp.arange(D)
    valid = jnp.stack(
        [((dpos + dd) >= 0) & ((dpos + dd) < D) for dd in (-1, 0, 1)], axis=0
    )                                                             # (3, D)
    w_lane = (w.astype(jnp.float32)[:, :, :, None, :]
              * valid.astype(jnp.float32)[None, None, :, :, None])
    w_lane = w_lane.reshape(KSIZE * KSIZE * KSIZE, L)             # (27, L)
    b_lane = jnp.tile(b.astype(jnp.float32), D).reshape(1, L)     # (1, L)

    kernel = functools.partial(_dwconv_kernel, C=C)

    out = pl.pallas_call(
        kernel,
        out_shape=jax.ShapeDtypeStruct((B, H, W, L), x.dtype),
        grid=(B, nh),
        in_specs=[
            # Current tile rows (leading batch dim squeezed out of the kernel ref).
            pl.BlockSpec((None, TH, W, L), lambda bi, hi: (bi, hi, 0, 0)),
            # Single halo rows above/below the tile; clamped at the volume edges and
            # gated to zero in-kernel (no host-side jnp.pad round trip).
            pl.BlockSpec((None, 1, W, L),
                         lambda bi, hi: (bi, jnp.maximum(hi * TH - 1, 0), 0, 0)),
            pl.BlockSpec((None, 1, W, L),
                         lambda bi, hi: (bi, jnp.minimum((hi + 1) * TH, H - 1), 0, 0)),
            pl.BlockSpec((KSIZE * KSIZE * KSIZE, L), lambda bi, hi: (0, 0)),
            pl.BlockSpec((1, L), lambda bi, hi: (0, 0)),
        ],
        out_specs=pl.BlockSpec((None, TH, W, L), lambda bi, hi: (bi, hi, 0, 0)),
        scratch_shapes=[pltpu.VMEM((TH, W, L), jnp.float32)],
        compiler_params=pltpu.CompilerParams(
            dimension_semantics=("parallel", "parallel"),
            vmem_limit_bytes=32 * 1024 * 1024,
        ),
    )(x4, x4, x4, w_lane, b_lane)

    return out.reshape(B, N, C)


def dwconv_reference(x, w, b, *, H, W, D):
    """Pure-JAX reference (lax depthwise conv) for correctness checking."""
    B, N, C = x.shape
    x5 = x.reshape(B, H, W, D, C)
    w_dhwio = w.reshape(KSIZE, KSIZE, KSIZE, 1, C)
    y = jax.lax.conv_general_dilated(
        x5.astype(jnp.float32),
        w_dhwio.astype(jnp.float32),
        window_strides=(1, 1, 1),
        padding="SAME",
        dimension_numbers=("NDHWC", "DHWIO", "NDHWC"),
        feature_group_count=C,
    ) + b.astype(jnp.float32)
    return y.reshape(B, N, C).astype(x.dtype)


if __name__ == "__main__":
    # Small deterministic example consistent with the module's depthwise conv block.
    B, C = 2, 16           # depthwise channel count
    H = W = D = 8
    N = H * W * D          # 512  (D*C = 128 -> fully lane-dense vregs/stores)

    key = jax.random.PRNGKey(0)
    kx, kw_, kb = jax.random.split(key, 3)
    x = jax.random.normal(kx, (B, N, C), dtype=jnp.float32)
    # PyTorch Conv3d(dim, dim, 3, groups=dim) weight (dim, 1, 3, 3, 3) stored here as
    # (3, 3, 3, dim) -- spatial-major, channels-last.
    w = 0.1 * jax.random.normal(kw_, (KSIZE, KSIZE, KSIZE, C), dtype=jnp.float32)
    b = 0.1 * jax.random.normal(kb, (C,), dtype=jnp.float32)

    out = dwconv_pallas(x, w, b, H=H, W=W, D=D)
    out = jax.block_until_ready(out)

    ref = dwconv_reference(x, w, b, H=H, W=W, D=D)
    assert out.shape == (B, N, C)
    assert jnp.allclose(out, ref, atol=1e-4, rtol=1e-4), "mismatch vs reference conv"

    print("KERNEL_OK")
</pallas_src>

<mosaic_0001>
module attributes {stable_mosaic.version = 11 : i64} {
  func.func @_dwconv_kernel(%arg0: i32, %arg1: i32, %arg2: memref<1x4x8x128xf32, #tpu.memory_space<vmem>>, %arg3: memref<1x1x8x128xf32, #tpu.memory_space<vmem>>, %arg4: memref<1x1x8x128xf32, #tpu.memory_space<vmem>>, %arg5: memref<27x128xf32, #tpu.memory_space<vmem>>, %arg6: memref<1x128xf32, #tpu.memory_space<vmem>>, %arg7: memref<1x4x8x128xf32, #tpu.memory_space<vmem>>, %arg8: memref<4x8x128xf32, #tpu.memory_space<vmem>>) attributes {dimension_semantics = [#tpu.dimension_semantics<parallel>, #tpu.dimension_semantics<parallel>], iteration_bounds = array<i64: 2, 2>, scalar_prefetch = 0 : i64, scratch_operands = 1 : i64, tpu.core_type = #tpu.core_type<tc>, window_params = [{transform_indices = @transform_0, window_bounds = array<i64: 1, 4, 8, 128>}, {transform_indices = @transform_1, window_bounds = array<i64: 1, 1, 8, 128>}, {transform_indices = @transform_2, window_bounds = array<i64: 1, 1, 8, 128>}, {pipeline_mode = #tpu.pipeline_mode<synchronous>, transform_indices = @transform_3, window_bounds = array<i64: 27, 128>}, {pipeline_mode = #tpu.pipeline_mode<synchronous>, transform_indices = @transform_4, window_bounds = array<i64: 1, 128>}, {transform_indices = @transform_5, window_bounds = array<i64: 1, 4, 8, 128>}]} {
    %c0_i32 = arith.constant 0 : i32
    %0 = arith.cmpi sgt, %arg1, %c0_i32 : i32
    %cst = arith.constant 1.000000e+00 : f32
    %cst_0 = arith.constant 0.000000e+00 : f32
    %1 = arith.select %0, %cst, %cst_0 : f32
    %c1_i32 = arith.constant 1 : i32
    %2 = arith.cmpi slt, %arg1, %c1_i32 : i32
    %cst_1 = arith.constant 1.000000e+00 : f32
    %cst_2 = arith.constant 0.000000e+00 : f32
    %3 = arith.select %2, %cst_1, %cst_2 : f32
    %c0 = arith.constant 0 : index
    %c0_3 = arith.constant 0 : index
    %4 = vector.load %arg5[%c0, %c0_3] : memref<27x128xf32, #tpu.memory_space<vmem>>, vector<27x128xf32>
    %c0_4 = arith.constant 0 : index
    %c0_5 = arith.constant 0 : index
    %5 = vector.load %arg6[%c0_4, %c0_5] : memref<1x128xf32, #tpu.memory_space<vmem>>, vector<1x128xf32>
    %c0_6 = arith.constant 0 : index
    %c0_7 = arith.constant 0 : index
    %c0_8 = arith.constant 0 : index
    %c0_9 = arith.constant 0 : index
    %6 = vector.load %arg2[%c0_6, %c0_7, %c0_8, %c0_9] : memref<1x4x8x128xf32, #tpu.memory_space<vmem>>, vector<1x4x8x128xf32>
    %7 = vector.shape_cast %6 : vector<1x4x8x128xf32> to vector<4x8x128xf32>
    %c16_i32 = arith.constant 16 : i32
    %8 = tpu.dynamic_rotate %7 by %c16_i32 dim 2 : vector<4x8x128xf32>, i32 -> vector<4x8x128xf32>
    %c112_i32 = arith.constant 112 : i32
    %9 = tpu.dynamic_rotate %7 by %c112_i32 dim 2 : vector<4x8x128xf32>, i32 -> vector<4x8x128xf32>
    %c0_10 = arith.constant 0 : index
    %c0_11 = arith.constant 0 : index
    %c0_12 = arith.constant 0 : index
    %c0_13 = arith.constant 0 : index
    %10 = vector.load %arg3[%c0_10, %c0_11, %c0_12, %c0_13] : memref<1x1x8x128xf32, #tpu.memory_space<vmem>>, vector<1x1x8x128xf32>
    %11 = vector.shape_cast %10 : vector<1x1x8x128xf32> to vector<1x8x128xf32>
    %c16_i32_14 = arith.constant 16 : i32
    %12 = tpu.dynamic_rotate %11 by %c16_i32_14 dim 2 : vector<1x8x128xf32>, i32 -> vector<1x8x128xf32>
    %c112_i32_15 = arith.constant 112 : i32
    %13 = tpu.dynamic_rotate %11 by %c112_i32_15 dim 2 : vector<1x8x128xf32>, i32 -> vector<1x8x128xf32>
    %c0_16 = arith.constant 0 : index
    %c0_17 = arith.constant 0 : index
    %c0_18 = arith.constant 0 : index
    %c0_19 = arith.constant 0 : index
    %14 = vector.load %arg4[%c0_16, %c0_17, %c0_18, %c0_19] : memref<1x1x8x128xf32, #tpu.memory_space<vmem>>, vector<1x1x8x128xf32>
    %15 = vector.shape_cast %14 : vector<1x1x8x128xf32> to vector<1x8x128xf32>
    %c16_i32_20 = arith.constant 16 : i32
    %16 = tpu.dynamic_rotate %15 by %c16_i32_20 dim 2 : vector<1x8x128xf32>, i32 -> vector<1x8x128xf32>
    %c112_i32_21 = arith.constant 112 : i32
    %17 = tpu.dynamic_rotate %15 by %c112_i32_21 dim 2 : vector<1x8x128xf32>, i32 -> vector<1x8x128xf32>
    %18 = vector.shape_cast %5 : vector<1x128xf32> to vector<1x1x128xf32>
    %19 = vector.broadcast %18 : vector<1x1x128xf32> to vector<4x8x128xf32>
    %c0_22 = arith.constant 0 : index
    %c0_23 = arith.constant 0 : index
    %c0_24 = arith.constant 0 : index
    %20 = vector.load %arg8[%c0_22, %c0_23, %c0_24] : memref<4x8x128xf32, #tpu.memory_space<vmem>>, vector<4x8x128xf32>
    tpu.vector_store %arg8[%c0_22, %c0_23, %c0_24], %19 {strides = array<i32>} : memref<4x8x128xf32, #tpu.memory_space<vmem>>, vector<4x8x128xf32>,
    %c0_25 = arith.constant 0 : index
    %c1 = arith.constant 1 : index
    %c0_26 = arith.constant 0 : index
    %21 = vector.load %arg8[%c0_25, %c1, %c0_26] : memref<4x8x128xf32, #tpu.memory_space<vmem>>, vector<4x7x128xf32>
    %22 = vector.extract_strided_slice %4 {offsets = [9, 0], sizes = [1, 128], strides = [1, 1]} : vector<27x128xf32> to vector<1x128xf32>
    %23 = vector.shape_cast %22 : vector<1x128xf32> to vector<1x1x128xf32>
    %24 = vector.broadcast %23 : vector<1x1x128xf32> to vector<4x8x128xf32>
    %25 = arith.mulf %24, %8 : vector<4x8x128xf32>
    %26 = vector.extract_strided_slice %4 {offsets = [10, 0], sizes = [1, 128], strides = [1, 1]} : vector<27x128xf32> to vector<1x128xf32>
    %27 = vector.shape_cast %26 : vector<1x128xf32> to vector<1x1x128xf32>
    %28 = vector.broadcast %27 : vector<1x1x128xf32> to vector<4x8x128xf32>
    %29 = arith.mulf %28, %7 : vector<4x8x128xf32>
    %30 = arith.addf %25, %29 : vector<4x8x128xf32>
    %31 = vector.extract_strided_slice %4 {offsets = [11, 0], sizes = [1, 128], strides = [1, 1]} : vector<27x128xf32> to vector<1x128xf32>
    %32 = vector.shape_cast %31 : vector<1x128xf32> to vector<1x1x128xf32>
    %33 = vector.broadcast %32 : vector<1x1x128xf32> to vector<4x8x128xf32>
    %34 = arith.mulf %33, %9 : vector<4x8x128xf32>
    %35 = arith.addf %30, %34 : vector<4x8x128xf32>
    %36 = vector.extract_strided_slice %35 {offsets = [0, 0, 0], sizes = [4, 7, 128], strides = [1, 1, 1]} : vector<4x8x128xf32> to vector<4x7x128xf32>
    %37 = arith.addf %21, %36 : vector<4x7x128xf32>
    %c0_27 = arith.constant 0 : index
    %c1_28 = arith.constant 1 : index
    %c0_29 = arith.constant 0 : index
    %38 = vector.load %arg8[%c0_27, %c1_28, %c0_29] : memref<4x8x128xf32, #tpu.memory_space<vmem>>, vector<4x7x128xf32>
    tpu.vector_store %arg8[%c0_27, %c1_28, %c0_29], %37 {strides = array<i32>} : memref<4x8x128xf32, #tpu.memory_space<vmem>>, vector<4x7x128xf32>,
    %39 = vector.extract_strided_slice %4 {offsets = [0, 0], sizes = [1, 128], strides = [1, 1]} : vector<27x128xf32> to vector<1x128xf32>
    %40 = vector.shape_cast %39 : vector<1x128xf32> to vector<1x1x128xf32>
    %41 = vector.broadcast %40 : vector<1x1x128xf32> to vector<4x8x128xf32>
    %42 = arith.mulf %41, %8 : vector<4x8x128xf32>
    %43 = vector.extract_strided_slice %4 {offsets = [1, 0], sizes = [1, 128], strides = [1, 1]} : vector<27x128xf32> to vector<1x128xf32>
    %44 = vector.shape_cast %43 : vector<1x128xf32> to vector<1x1x128xf32>
    %45 = vector.broadcast %44 : vector<1x1x128xf32> to vector<4x8x128xf32>
    %46 = arith.mulf %45, %7 : vector<4x8x128xf32>
    %47 = arith.addf %42, %46 : vector<4x8x128xf32>
    %48 = vector.extract_strided_slice %4 {offsets = [2, 0], sizes = [1, 128], strides = [1, 1]} : vector<27x128xf32> to vector<1x128xf32>
    %49 = vector.shape_cast %48 : vector<1x128xf32> to vector<1x1x128xf32>
    %50 = vector.broadcast %49 : vector<1x1x128xf32> to vector<4x8x128xf32>
    %51 = arith.mulf %50, %9 : vector<4x8x128xf32>
    %52 = arith.addf %47, %51 : vector<4x8x128xf32>
    %c0_30 = arith.constant 0 : index
    %c1_31 = arith.constant 1 : index
    %c0_32 = arith.constant 0 : index
    %53 = vector.load %arg8[%c0_30, %c1_31, %c0_32] : memref<4x8x128xf32, #tpu.memory_space<vmem>>, vector<1x7x128xf32>
    %54 = vector.extract_strided_slice %4 {offsets = [0, 0], sizes = [1, 128], strides = [1, 1]} : vector<27x128xf32> to vector<1x128xf32>
    %55 = vector.shape_cast %54 : vector<1x128xf32> to vector<1x1x128xf32>
    %56 = vector.broadcast %55 : vector<1x1x128xf32> to vector<1x8x128xf32>
    %57 = arith.mulf %56, %12 : vector<1x8x128xf32>
    %58 = vector.extract_strided_slice %4 {offsets = [1, 0], sizes = [1, 128], strides = [1, 1]} : vector<27x128xf32> to vector<1x128xf32>
    %59 = vector.shape_cast %58 : vector<1x128xf32> to vector<1x1x128xf32>
    %60 = vector.broadcast %59 : vector<1x1x128xf32> to vector<1x8x128xf32>
    %61 = arith.mulf %60, %11 : vector<1x8x128xf32>
    %62 = arith.addf %57, %61 : vector<1x8x128xf32>
    %63 = vector.extract_strided_slice %4 {offsets = [2, 0], sizes = [1, 128], strides = [1, 1]} : vector<27x128xf32> to vector<1x128xf32>
    %64 = vector.shape_cast %63 : vector<1x128xf32> to vector<1x1x128xf32>
    %65 = vector.broadcast %64 : vector<1x1x128xf32> to vector<1x8x128xf32>
    %66 = arith.mulf %65, %13 : vector<1x8x128xf32>
    %67 = arith.addf %62, %66 : vector<1x8x128xf32>
    %68 = vector.extract_strided_slice %67 {offsets = [0, 0, 0], sizes = [1, 7, 128], strides = [1, 1, 1]} : vector<1x8x128xf32> to vector<1x7x128xf32>
    %69 = vector.broadcast %1 : f32 to vector<1x7x128xf32>
    %70 = arith.mulf %69, %68 : vector<1x7x128xf32>
    %71 = arith.addf %53, %70 : vector<1x7x128xf32>
    %c0_33 = arith.constant 0 : index
    %c1_34 = arith.constant 1 : index
    %c0_35 = arith.constant 0 : index
    %72 = vector.load %arg8[%c0_33, %c1_34, %c0_35] : memref<4x8x128xf32, #tpu.memory_space<vmem>>, vector<1x7x128xf32>
    tpu.vector_store %arg8[%c0_33, %c1_34, %c0_35], %71 {strides = array<i32>} : memref<4x8x128xf32, #tpu.memory_space<vmem>>, vector<1x7x128xf32>,
    %c1_36 = arith.constant 1 : index
    %c1_37 = arith.constant 1 : index
    %c0_38 = arith.constant 0 : index
    %73 = vector.load %arg8[%c1_36, %c1_37, %c0_38] : memref<4x8x128xf32, #tpu.memory_space<vmem>>, vector<3x7x128xf32>
    %74 = vector.extract_strided_slice %52 {offsets = [0, 0, 0], sizes = [3, 7, 128], strides = [1, 1, 1]} : vector<4x8x128xf32> to vector<3x7x128xf32>
    %75 = arith.addf %73, %74 : vector<3x7x128xf32>
    %c1_39 = arith.constant 1 : index
    %c1_40 = arith.constant 1 : index
    %c0_41 = arith.constant 0 : index
    %76 = vector.load %arg8[%c1_39, %c1_40, %c0_41] : memref<4x8x128xf32, #tpu.memory_space<vmem>>, vector<3x7x128xf32>
    tpu.vector_store %arg8[%c1_39, %c1_40, %c0_41], %75 {strides = array<i32>} : memref<4x8x128xf32, #tpu.memory_space<vmem>>, vector<3x7x128xf32>,
    %77 = vector.extract_strided_slice %4 {offsets = [18, 0], sizes = [1, 128], strides = [1, 1]} : vector<27x128xf32> to vector<1x128xf32>
    %78 = vector.shape_cast %77 : vector<1x128xf32> to vector<1x1x128xf32>
    %79 = vector.broadcast %78 : vector<1x1x128xf32> to vector<4x8x128xf32>
    %80 = arith.mulf %79, %8 : vector<4x8x128xf32>
    %81 = vector.extract_strided_slice %4 {offsets = [19, 0], sizes = [1, 128], strides = [1, 1]} : vector<27x128xf32> to vector<1x128xf32>
    %82 = vector.shape_cast %81 : vector<1x128xf32> to vector<1x1x128xf32>
    %83 = vector.broadcast %82 : vector<1x1x128xf32> to vector<4x8x128xf32>
    %84 = arith.mulf %83, %7 : vector<4x8x128xf32>
    %85 = arith.addf %80, %84 : vector<4x8x128xf32>
    %86 = vector.extract_strided_slice %4 {offsets = [20, 0], sizes = [1, 128], strides = [1, 1]} : vector<27x128xf32> to vector<1x128xf32>
    %87 = vector.shape_cast %86 : vector<1x128xf32> to vector<1x1x128xf32>
    %88 = vector.broadcast %87 : vector<1x1x128xf32> to vector<4x8x128xf32>
    %89 = arith.mulf %88, %9 : vector<4x8x128xf32>
    %90 = arith.addf %85, %89 : vector<4x8x128xf32>
    %c0_42 = arith.constant 0 : index
    %c1_43 = arith.constant 1 : index
    %c0_44 = arith.constant 0 : index
    %91 = vector.load %arg8[%c0_42, %c1_43, %c0_44] : memref<4x8x128xf32, #tpu.memory_space<vmem>>, vector<3x7x128xf32>
    %92 = vector.extract_strided_slice %90 {offsets = [1, 0, 0], sizes = [3, 7, 128], strides = [1, 1, 1]} : vector<4x8x128xf32> to vector<3x7x128xf32>
    %93 = arith.addf %91, %92 : vector<3x7x128xf32>
    %c0_45 = arith.constant 0 : index
    %c1_46 = arith.constant 1 : index
    %c0_47 = arith.constant 0 : index
    %94 = vector.load %arg8[%c0_45, %c1_46, %c0_47] : memref<4x8x128xf32, #tpu.memory_space<vmem>>, vector<3x7x128xf32>
    tpu.vector_store %arg8[%c0_45, %c1_46, %c0_47], %93 {strides = array<i32>} : memref<4x8x128xf32, #tpu.memory_space<vmem>>, vector<3x7x128xf32>,
    %c3 = arith.constant 3 : index
    %c1_48 = arith.constant 1 : index
    %c0_49 = arith.constant 0 : index
    %95 = vector.load %arg8[%c3, %c1_48, %c0_49] : memref<4x8x128xf32, #tpu.memory_space<vmem>>, vector<1x7x128xf32>
    %96 = vector.extract_strided_slice %4 {offsets = [18, 0], sizes = [1, 128], strides = [1, 1]} : vector<27x128xf32> to vector<1x128xf32>
    %97 = vector.shape_cast %96 : vector<1x128xf32> to vector<1x1x128xf32>
    %98 = vector.broadcast %97 : vector<1x1x128xf32> to vector<1x8x128xf32>
    %99 = arith.mulf %98, %16 : vector<1x8x128xf32>
    %100 = vector.extract_strided_slice %4 {offsets = [19, 0], sizes = [1, 128], strides = [1, 1]} : vector<27x128xf32> to vector<1x128xf32>
    %101 = vector.shape_cast %100 : vector<1x128xf32> to vector<1x1x128xf32>
    %102 = vector.broadcast %101 : vector<1x1x128xf32> to vector<1x8x128xf32>
    %103 = arith.mulf %102, %15 : vector<1x8x128xf32>
    %104 = arith.addf %99, %103 : vector<1x8x128xf32>
    %105 = vector.extract_strided_slice %4 {offsets = [20, 0], sizes = [1, 128], strides = [1, 1]} : vector<27x128xf32> to vector<1x128xf32>
    %106 = vector.shape_cast %105 : vector<1x128xf32> to vector<1x1x128xf32>
    %107 = vector.broadcast %106 : vector<1x1x128xf32> to vector<1x8x128xf32>
    %108 = arith.mulf %107, %17 : vector<1x8x128xf32>
    %109 = arith.addf %104, %108 : vector<1x8x128xf32>
    %110 = vector.extract_strided_slice %109 {offsets = [0, 0, 0], sizes = [1, 7, 128], strides = [1, 1, 1]} : vector<1x8x128xf32> to vector<1x7x128xf32>
    %111 = vector.broadcast %3 : f32 to vector<1x7x128xf32>
    %112 = arith.mulf %111, %110 : vector<1x7x128xf32>
    %113 = arith.addf %95, %112 : vector<1x7x128xf32>
    %c3_50 = arith.constant 3 : index
    %c1_51 = arith.constant 1 : index
    %c0_52 = arith.constant 0 : index
    %114 = vector.load %arg8[%c3_50, %c1_51, %c0_52] : memref<4x8x128xf32, #tpu.memory_space<vmem>>, vector<1x7x128xf32>
    tpu.vector_store %arg8[%c3_50, %c1_51, %c0_52], %113 {strides = array<i32>} : memref<4x8x128xf32, #tpu.memory_space<vmem>>, vector<1x7x128xf32>,
    %c0_53 = arith.constant 0 : index
    %c0_54 = arith.constant 0 : index
    %c0_55 = arith.constant 0 : index
    %115 = vector.load %arg8[%c0_53, %c0_54, %c0_55] : memref<4x8x128xf32, #tpu.memory_space<vmem>>, vector<4x8x128xf32>
    %116 = vector.extract_strided_slice %4 {offsets = [12, 0], sizes = [1, 128], strides = [1, 1]} : vector<27x128xf32> to vector<1x128xf32>
    %117 = vector.shape_cast %116 : vector<1x128xf32> to vector<1x1x128xf32>
    %118 = vector.broadcast %117 : vector<1x1x128xf32> to vector<4x8x128xf32>
    %119 = arith.mulf %118, %8 : vector<4x8x128xf32>
    %120 = vector.extract_strided_slice %4 {offsets = [13, 0], sizes = [1, 128], strides = [1, 1]} : vector<27x128xf32> to vector<1x128xf32>
    %121 = vector.shape_cast %120 : vector<1x128xf32> to vector<1x1x128xf32>
    %122 = vector.broadcast %121 : vector<1x1x128xf32> to vector<4x8x128xf32>
    %123 = arith.mulf %122, %7 : vector<4x8x128xf32>
    %124 = arith.addf %119, %123 : vector<4x8x128xf32>
    %125 = vector.extract_strided_slice %4 {offsets = [14, 0], sizes = [1, 128], strides = [1, 1]} : vector<27x128xf32> to vector<1x128xf32>
    %126 = vector.shape_cast %125 : vector<1x128xf32> to vector<1x1x128xf32>
    %127 = vector.broadcast %126 : vector<1x1x128xf32> to vector<4x8x128xf32>
    %128 = arith.mulf %127, %9 : vector<4x8x128xf32>
    %129 = arith.addf %124, %128 : vector<4x8x128xf32>
    %130 = arith.addf %115, %129 : vector<4x8x128xf32>
    %c0_56 = arith.constant 0 : index
    %c0_57 = arith.constant 0 : index
    %c0_58 = arith.constant 0 : index
    %131 = vector.load %arg8[%c0_56, %c0_57, %c0_58] : memref<4x8x128xf32, #tpu.memory_space<vmem>>, vector<4x8x128xf32>
    tpu.vector_store %arg8[%c0_56, %c0_57, %c0_58], %130 {strides = array<i32>} : memref<4x8x128xf32, #tpu.memory_space<vmem>>, vector<4x8x128xf32>,
    %132 = vector.extract_strided_slice %4 {offsets = [3, 0], sizes = [1, 128], strides = [1, 1]} : vector<27x128xf32> to vector<1x128xf32>
    %133 = vector.shape_cast %132 : vector<1x128xf32> to vector<1x1x128xf32>
    %134 = vector.broadcast %133 : vector<1x1x128xf32> to vector<4x8x128xf32>
    %135 = arith.mulf %134, %8 : vector<4x8x128xf32>
    %136 = vector.extract_strided_slice %4 {offsets = [4, 0], sizes = [1, 128], strides = [1, 1]} : vector<27x128xf32> to vector<1x128xf32>
    %137 = vector.shape_cast %136 : vector<1x128xf32> to vector<1x1x128xf32>
    %138 = vector.broadcast %137 : vector<1x1x128xf32> to vector<4x8x128xf32>
    %139 = arith.mulf %138, %7 : vector<4x8x128xf32>
    %140 = arith.addf %135, %139 : vector<4x8x128xf32>
    %141 = vector.extract_strided_slice %4 {offsets = [5, 0], sizes = [1, 128], strides = [1, 1]} : vector<27x128xf32> to vector<1x128xf32>
    %142 = vector.shape_cast %141 : vector<1x128xf32> to vector<1x1x128xf32>
    %143 = vector.broadcast %142 : vector<1x1x128xf32> to vector<4x8x128xf32>
    %144 = arith.mulf %143, %9 : vector<4x8x128xf32>
    %145 = arith.addf %140, %144 : vector<4x8x128xf32>
    %c0_59 = arith.constant 0 : index
    %c0_60 = arith.constant 0 : index
    %c0_61 = arith.constant 0 : index
    %146 = vector.load %arg8[%c0_59, %c0_60, %c0_61] : memref<4x8x128xf32, #tpu.memory_space<vmem>>, vector<1x8x128xf32>
    %147 = vector.extract_strided_slice %4 {offsets = [3, 0], sizes = [1, 128], strides = [1, 1]} : vector<27x128xf32> to vector<1x128xf32>
    %148 = vector.shape_cast %147 : vector<1x128xf32> to vector<1x1x128xf32>
    %149 = vector.broadcast %148 : vector<1x1x128xf32> to vector<1x8x128xf32>
    %150 = arith.mulf %149, %12 : vector<1x8x128xf32>
    %151 = vector.extract_strided_slice %4 {offsets = [4, 0], sizes = [1, 128], strides = [1, 1]} : vector<27x128xf32> to vector<1x128xf32>
    %152 = vector.shape_cast %151 : vector<1x128xf32> to vector<1x1x128xf32>
    %153 = vector.broadcast %152 : vector<1x1x128xf32> to vector<1x8x128xf32>
    %154 = arith.mulf %153, %11 : vector<1x8x128xf32>
    %155 = arith.addf %150, %154 : vector<1x8x128xf32>
    %156 = vector.extract_strided_slice %4 {offsets = [5, 0], sizes = [1, 128], strides = [1, 1]} : vector<27x128xf32> to vector<1x128xf32>
    %157 = vector.shape_cast %156 : vector<1x128xf32> to vector<1x1x128xf32>
    %158 = vector.broadcast %157 : vector<1x1x128xf32> to vector<1x8x128xf32>
    %159 = arith.mulf %158, %13 : vector<1x8x128xf32>
    %160 = arith.addf %155, %159 : vector<1x8x128xf32>
    %161 = vector.broadcast %1 : f32 to vector<1x8x128xf32>
    %162 = arith.mulf %161, %160 : vector<1x8x128xf32>
    %163 = arith.addf %146, %162 : vector<1x8x128xf32>
    %c0_62 = arith.constant 0 : index
    %c0_63 = arith.constant 0 : index
    %c0_64 = arith.constant 0 : index
    %164 = vector.load %arg8[%c0_62, %c0_63, %c0_64] : memref<4x8x128xf32, #tpu.memory_space<vmem>>, vector<1x8x128xf32>
    tpu.vector_store %arg8[%c0_62, %c0_63, %c0_64], %163 {strides = array<i32>} : memref<4x8x128xf32, #tpu.memory_space<vmem>>, vector<1x8x128xf32>,
    %c1_65 = arith.constant 1 : index
    %c0_66 = arith.constant 0 : index
    %c0_67 = arith.constant 0 : index
    %165 = vector.load %arg8[%c1_65, %c0_66, %c0_67] : memref<4x8x128xf32, #tpu.memory_space<vmem>>, vector<3x8x128xf32>
    %166 = vector.extract_strided_slice %145 {offsets = [0, 0, 0], sizes = [3, 8, 128], strides = [1, 1, 1]} : vector<4x8x128xf32> to vector<3x8x128xf32>
    %167 = arith.addf %165, %166 : vector<3x8x128xf32>
    %c1_68 = arith.constant 1 : index
    %c0_69 = arith.constant 0 : index
    %c0_70 = arith.constant 0 : index
    %168 = vector.load %arg8[%c1_68, %c0_69, %c0_70] : memref<4x8x128xf32, #tpu.memory_space<vmem>>, vector<3x8x128xf32>
    tpu.vector_store %arg8[%c1_68, %c0_69, %c0_70], %167 {strides = array<i32>} : memref<4x8x128xf32, #tpu.memory_space<vmem>>, vector<3x8x128xf32>,
    %169 = vector.extract_strided_slice %4 {offsets = [21, 0], sizes = [1, 128], strides = [1, 1]} : vector<27x128xf32> to vector<1x128xf32>
    %170 = vector.shape_cast %169 : vector<1x128xf32> to vector<1x1x128xf32>
    %171 = vector.broadcast %170 : vector<1x1x128xf32> to vector<4x8x128xf32>
    %172 = arith.mulf %171, %8 : vector<4x8x128xf32>
    %173 = vector.extract_strided_slice %4 {offsets = [22, 0], sizes = [1, 128], strides = [1, 1]} : vector<27x128xf32> to vector<1x128xf32>
    %174 = vector.shape_cast %173 : vector<1x128xf32> to vector<1x1x128xf32>
    %175 = vector.broadcast %174 : vector<1x1x128xf32> to vector<4x8x128xf32>
    %176 = arith.mulf %175, %7 : vector<4x8x128xf32>
    %177 = arith.addf %172, %176 : vector<4x8x128xf32>
    %178 = vector.extract_strided_slice %4 {offsets = [23, 0], sizes = [1, 128], strides = [1, 1]} : vector<27x128xf32> to vector<1x128xf32>
    %179 = vector.shape_cast %178 : vector<1x128xf32> to vector<1x1x128xf32>
    %180 = vector.broadcast %179 : vector<1x1x128xf32> to vector<4x8x128xf32>
    %181 = arith.mulf %180, %9 : vector<4x8x128xf32>
    %182 = arith.addf %177, %181 : vector<4x8x128xf32>
    %c0_71 = arith.constant 0 : index
    %c0_72 = arith.constant 0 : index
    %c0_73 = arith.constant 0 : index
    %183 = vector.load %arg8[%c0_71, %c0_72, %c0_73] : memref<4x8x128xf32, #tpu.memory_space<vmem>>, vector<3x8x128xf32>
    %184 = vector.extract_strided_slice %182 {offsets = [1, 0, 0], sizes = [3, 8, 128], strides = [1, 1, 1]} : vector<4x8x128xf32> to vector<3x8x128xf32>
    %185 = arith.addf %183, %184 : vector<3x8x128xf32>
    %c0_74 = arith.constant 0 : index
    %c0_75 = arith.constant 0 : index
    %c0_76 = arith.constant 0 : index
    %186 = vector.load %arg8[%c0_74, %c0_75, %c0_76] : memref<4x8x128xf32, #tpu.memory_space<vmem>>, vector<3x8x128xf32>
    tpu.vector_store %arg8[%c0_74, %c0_75, %c0_76], %185 {strides = array<i32>} : memref<4x8x128xf32, #tpu.memory_space<vmem>>, vector<3x8x128xf32>,
    %c3_77 = arith.constant 3 : index
    %c0_78 = arith.constant 0 : index
    %c0_79 = arith.constant 0 : index
    %187 = vector.load %arg8[%c3_77, %c0_78, %c0_79] : memref<4x8x128xf32, #tpu.memory_space<vmem>>, vector<1x8x128xf32>
    %188 = vector.extract_strided_slice %4 {offsets = [21, 0], sizes = [1, 128], strides = [1, 1]} : vector<27x128xf32> to vector<1x128xf32>
    %189 = vector.shape_cast %188 : vector<1x128xf32> to vector<1x1x128xf32>
    %190 = vector.broadcast %189 : vector<1x1x128xf32> to vector<1x8x128xf32>
    %191 = arith.mulf %190, %16 : vector<1x8x128xf32>
    %192 = vector.extract_strided_slice %4 {offsets = [22, 0], sizes = [1, 128], strides = [1, 1]} : vector<27x128xf32> to vector<1x128xf32>
    %193 = vector.shape_cast %192 : vector<1x128xf32> to vector<1x1x128xf32>
    %194 = vector.broadcast %193 : vector<1x1x128xf32> to vector<1x8x128xf32>
    %195 = arith.mulf %194, %15 : vector<1x8x128xf32>
    %196 = arith.addf %191, %195 : vector<1x8x128xf32>
    %197 = vector.extract_strided_slice %4 {offsets = [23, 0], sizes = [1, 128], strides = [1, 1]} : vector<27x128xf32> to vector<1x128xf32>
    %198 = vector.shape_cast %197 : vector<1x128xf32> to vector<1x1x128xf32>
    %199 = vector.broadcast %198 : vector<1x1x128xf32> to vector<1x8x128xf32>
    %200 = arith.mulf %199, %17 : vector<1x8x128xf32>
    %201 = arith.addf %196, %200 : vector<1x8x128xf32>
    %202 = vector.broadcast %3 : f32 to vector<1x8x128xf32>
    %203 = arith.mulf %202, %201 : vector<1x8x128xf32>
    %204 = arith.addf %187, %203 : vector<1x8x128xf32>
    %c3_80 = arith.constant 3 : index
    %c0_81 = arith.constant 0 : index
    %c0_82 = arith.constant 0 : index
    %205 = vector.load %arg8[%c3_80, %c0_81, %c0_82] : memref<4x8x128xf32, #tpu.memory_space<vmem>>, vector<1x8x128xf32>
    tpu.vector_store %arg8[%c3_80, %c0_81, %c0_82], %204 {strides = array<i32>} : memref<4x8x128xf32, #tpu.memory_space<vmem>>, vector<1x8x128xf32>,
    %c0_83 = arith.constant 0 : index
    %c0_84 = arith.constant 0 : index
    %c0_85 = arith.constant 0 : index
    %206 = vector.load %arg8[%c0_83, %c0_84, %c0_85] : memref<4x8x128xf32, #tpu.memory_space<vmem>>, vector<4x7x128xf32>
    %207 = vector.extract_strided_slice %4 {offsets = [15, 0], sizes = [1, 128], strides = [1, 1]} : vector<27x128xf32> to vector<1x128xf32>
    %208 = vector.shape_cast %207 : vector<1x128xf32> to vector<1x1x128xf32>
    %209 = vector.broadcast %208 : vector<1x1x128xf32> to vector<4x8x128xf32>
    %210 = arith.mulf %209, %8 : vector<4x8x128xf32>
    %211 = vector.extract_strided_slice %4 {offsets = [16, 0], sizes = [1, 128], strides = [1, 1]} : vector<27x128xf32> to vector<1x128xf32>
    %212 = vector.shape_cast %211 : vector<1x128xf32> to vector<1x1x128xf32>
    %213 = vector.broadcast %212 : vector<1x1x128xf32> to vector<4x8x128xf32>
    %214 = arith.mulf %213, %7 : vector<4x8x128xf32>
    %215 = arith.addf %210, %214 : vector<4x8x128xf32>
    %216 = vector.extract_strided_slice %4 {offsets = [17, 0], sizes = [1, 128], strides = [1, 1]} : vector<27x128xf32> to vector<1x128xf32>
    %217 = vector.shape_cast %216 : vector<1x128xf32> to vector<1x1x128xf32>
    %218 = vector.broadcast %217 : vector<1x1x128xf32> to vector<4x8x128xf32>
    %219 = arith.mulf %218, %9 : vector<4x8x128xf32>
    %220 = arith.addf %215, %219 : vector<4x8x128xf32>
    %221 = vector.extract_strided_slice %220 {offsets = [0, 1, 0], sizes = [4, 7, 128], strides = [1, 1, 1]} : vector<4x8x128xf32> to vector<4x7x128xf32>
    %222 = arith.addf %206, %221 : vector<4x7x128xf32>
    %c0_86 = arith.constant 0 : index
    %c0_87 = arith.constant 0 : index
    %c0_88 = arith.constant 0 : index
    %223 = vector.load %arg8[%c0_86, %c0_87, %c0_88] : memref<4x8x128xf32, #tpu.memory_space<vmem>>, vector<4x7x128xf32>
    tpu.vector_store %arg8[%c0_86, %c0_87, %c0_88], %222 {strides = array<i32>} : memref<4x8x128xf32, #tpu.memory_space<vmem>>, vector<4x7x128xf32>,
    %224 = vector.extract_strided_slice %4 {offsets = [6, 0], sizes = [1, 128], strides = [1, 1]} : vector<27x128xf32> to vector<1x128xf32>
    %225 = vector.shape_cast %224 : vector<1x128xf32> to vector<1x1x128xf32>
    %226 = vector.broadcast %225 : vector<1x1x128xf32> to vector<4x8x128xf32>
    %227 = arith.mulf %226, %8 : vector<4x8x128xf32>
    %228 = vector.extract_strided_slice %4 {offsets = [7, 0], sizes = [1, 128], strides = [1, 1]} : vector<27x128xf32> to vector<1x128xf32>
    %229 = vector.shape_cast %228 : vector<1x128xf32> to vector<1x1x128xf32>
    %230 = vector.broadcast %229 : vector<1x1x128xf32> to vector<4x8x128xf32>
    %231 = arith.mulf %230, %7 : vector<4x8x128xf32>
    %232 = arith.addf %227, %231 : vector<4x8x128xf32>
    %233 = vector.extract_strided_slice %4 {offsets = [8, 0], sizes = [1, 128], strides = [1, 1]} : vector<27x128xf32> to vector<1x128xf32>
    %234 = vector.shape_cast %233 : vector<1x128xf32> to vector<1x1x128xf32>
    %235 = vector.broadcast %234 : vector<1x1x128xf32> to vector<4x8x128xf32>
    %236 = arith.mulf %235, %9 : vector<4x8x128xf32>
    %237 = arith.addf %232, %236 : vector<4x8x128xf32>
    %c0_89 = arith.constant 0 : index
    %c0_90 = arith.constant 0 : index
    %c0_91 = arith.constant 0 : index
    %238 = vector.load %arg8[%c0_89, %c0_90, %c0_91] : memref<4x8x128xf32, #tpu.memory_space<vmem>>, vector<1x7x128xf32>
    %239 = vector.extract_strided_slice %4 {offsets = [6, 0], sizes = [1, 128], strides = [1, 1]} : vector<27x128xf32> to vector<1x128xf32>
    %240 = vector.shape_cast %239 : vector<1x128xf32> to vector<1x1x128xf32>
    %241 = vector.broadcast %240 : vector<1x1x128xf32> to vector<1x8x128xf32>
    %242 = arith.mulf %241, %12 : vector<1x8x128xf32>
    %243 = vector.extract_strided_slice %4 {offsets = [7, 0], sizes = [1, 128], strides = [1, 1]} : vector<27x128xf32> to vector<1x128xf32>
    %244 = vector.shape_cast %243 : vector<1x128xf32> to vector<1x1x128xf32>
    %245 = vector.broadcast %244 : vector<1x1x128xf32> to vector<1x8x128xf32>
    %246 = arith.mulf %245, %11 : vector<1x8x128xf32>
    %247 = arith.addf %242, %246 : vector<1x8x128xf32>
    %248 = vector.extract_strided_slice %4 {offsets = [8, 0], sizes = [1, 128], strides = [1, 1]} : vector<27x128xf32> to vector<1x128xf32>
    %249 = vector.shape_cast %248 : vector<1x128xf32> to vector<1x1x128xf32>
    %250 = vector.broadcast %249 : vector<1x1x128xf32> to vector<1x8x128xf32>
    %251 = arith.mulf %250, %13 : vector<1x8x128xf32>
    %252 = arith.addf %247, %251 : vector<1x8x128xf32>
    %253 = vector.extract_strided_slice %252 {offsets = [0, 1, 0], sizes = [1, 7, 128], strides = [1, 1, 1]} : vector<1x8x128xf32> to vector<1x7x128xf32>
    %254 = vector.broadcast %1 : f32 to vector<1x7x128xf32>
    %255 = arith.mulf %254, %253 : vector<1x7x128xf32>
    %256 = arith.addf %238, %255 : vector<1x7x128xf32>
    %c0_92 = arith.constant 0 : index
    %c0_93 = arith.constant 0 : index
    %c0_94 = arith.constant 0 : index
    %257 = vector.load %arg8[%c0_92, %c0_93, %c0_94] : memref<4x8x128xf32, #tpu.memory_space<vmem>>, vector<1x7x128xf32>
    tpu.vector_store %arg8[%c0_92, %c0_93, %c0_94], %256 {strides = array<i32>} : memref<4x8x128xf32, #tpu.memory_space<vmem>>, vector<1x7x128xf32>,
    %c1_95 = arith.constant 1 : index
    %c0_96 = arith.constant 0 : index
    %c0_97 = arith.constant 0 : index
    %258 = vector.load %arg8[%c1_95, %c0_96, %c0_97] : memref<4x8x128xf32, #tpu.memory_space<vmem>>, vector<3x7x128xf32>
    %259 = vector.extract_strided_slice %237 {offsets = [0, 1, 0], sizes = [3, 7, 128], strides = [1, 1, 1]} : vector<4x8x128xf32> to vector<3x7x128xf32>
    %260 = arith.addf %258, %259 : vector<3x7x128xf32>
    %c1_98 = arith.constant 1 : index
    %c0_99 = arith.constant 0 : index
    %c0_100 = arith.constant 0 : index
    %261 = vector.load %arg8[%c1_98, %c0_99, %c0_100] : memref<4x8x128xf32, #tpu.memory_space<vmem>>, vector<3x7x128xf32>
    tpu.vector_store %arg8[%c1_98, %c0_99, %c0_100], %260 {strides = array<i32>} : memref<4x8x128xf32, #tpu.memory_space<vmem>>, vector<3x7x128xf32>,
    %262 = vector.extract_strided_slice %4 {offsets = [24, 0], sizes = [1, 128], strides = [1, 1]} : vector<27x128xf32> to vector<1x128xf32>
    %263 = vector.shape_cast %262 : vector<1x128xf32> to vector<1x1x128xf32>
    %264 = vector.broadcast %263 : vector<1x1x128xf32> to vector<4x8x128xf32>
    %265 = arith.mulf %264, %8 : vector<4x8x128xf32>
    %266 = vector.extract_strided_slice %4 {offsets = [25, 0], sizes = [1, 128], strides = [1, 1]} : vector<27x128xf32> to vector<1x128xf32>
    %267 = vector.shape_cast %266 : vector<1x128xf32> to vector<1x1x128xf32>
    %268 = vector.broadcast %267 : vector<1x1x128xf32> to vector<4x8x128xf32>
    %269 = arith.mulf %268, %7 : vector<4x8x128xf32>
    %270 = arith.addf %265, %269 : vector<4x8x128xf32>
    %271 = vector.extract_strided_slice %4 {offsets = [26, 0], sizes = [1, 128], strides = [1, 1]} : vector<27x128xf32> to vector<1x128xf32>
    %272 = vector.shape_cast %271 : vector<1x128xf32> to vector<1x1x128xf32>
    %273 = vector.broadcast %272 : vector<1x1x128xf32> to vector<4x8x128xf32>
    %274 = arith.mulf %273, %9 : vector<4x8x128xf32>
    %275 = arith.addf %270, %274 : vector<4x8x128xf32>
    %c0_101 = arith.constant 0 : index
    %c0_102 = arith.constant 0 : index
    %c0_103 = arith.constant 0 : index
    %276 = vector.load %arg8[%c0_101, %c0_102, %c0_103] : memref<4x8x128xf32, #tpu.memory_space<vmem>>, vector<3x7x128xf32>
    %277 = vector.extract_strided_slice %275 {offsets = [1, 1, 0], sizes = [3, 7, 128], strides = [1, 1, 1]} : vector<4x8x128xf32> to vector<3x7x128xf32>
    %278 = arith.addf %276, %277 : vector<3x7x128xf32>
    %c0_104 = arith.constant 0 : index
    %c0_105 = arith.constant 0 : index
    %c0_106 = arith.constant 0 : index
    %279 = vector.load %arg8[%c0_104, %c0_105, %c0_106] : memref<4x8x128xf32, #tpu.memory_space<vmem>>, vector<3x7x128xf32>
    tpu.vector_store %arg8[%c0_104, %c0_105, %c0_106], %278 {strides = array<i32>} : memref<4x8x128xf32, #tpu.memory_space<vmem>>, vector<3x7x128xf32>,
    %c3_107 = arith.constant 3 : index
    %c0_108 = arith.constant 0 : index
    %c0_109 = arith.constant 0 : index
    %280 = vector.load %arg8[%c3_107, %c0_108, %c0_109] : memref<4x8x128xf32, #tpu.memory_space<vmem>>, vector<1x7x128xf32>
    %281 = vector.extract_strided_slice %4 {offsets = [24, 0], sizes = [1, 128], strides = [1, 1]} : vector<27x128xf32> to vector<1x128xf32>
    %282 = vector.shape_cast %281 : vector<1x128xf32> to vector<1x1x128xf32>
    %283 = vector.broadcast %282 : vector<1x1x128xf32> to vector<1x8x128xf32>
    %284 = arith.mulf %283, %16 : vector<1x8x128xf32>
    %285 = vector.extract_strided_slice %4 {offsets = [25, 0], sizes = [1, 128], strides = [1, 1]} : vector<27x128xf32> to vector<1x128xf32>
    %286 = vector.shape_cast %285 : vector<1x128xf32> to vector<1x1x128xf32>
    %287 = vector.broadcast %286 : vector<1x1x128xf32> to vector<1x8x128xf32>
    %288 = arith.mulf %287, %15 : vector<1x8x128xf32>
    %289 = arith.addf %284, %288 : vector<1x8x128xf32>
    %290 = vector.extract_strided_slice %4 {offsets = [26, 0], sizes = [1, 128], strides = [1, 1]} : vector<27x128xf32> to vector<1x128xf32>
    %291 = vector.shape_cast %290 : vector<1x128xf32> to vector<1x1x128xf32>
    %292 = vector.broadcast %291 : vector<1x1x128xf32> to vector<1x8x128xf32>
    %293 = arith.mulf %292, %17 : vector<1x8x128xf32>
    %294 = arith.addf %289, %293 : vector<1x8x128xf32>
    %295 = vector.extract_strided_slice %294 {offsets = [0, 1, 0], sizes = [1, 7, 128], strides = [1, 1, 1]} : vector<1x8x128xf32> to vector<1x7x128xf32>
    %296 = vector.broadcast %3 : f32 to vector<1x7x128xf32>
    %297 = arith.mulf %296, %295 : vector<1x7x128xf32>
    %298 = arith.addf %280, %297 : vector<1x7x128xf32>
    %c3_110 = arith.constant 3 : index
    %c0_111 = arith.constant 0 : index
    %c0_112 = arith.constant 0 : index
    %299 = vector.load %arg8[%c3_110, %c0_111, %c0_112] : memref<4x8x128xf32, #tpu.memory_space<vmem>>, vector<1x7x128xf32>
    tpu.vector_store %arg8[%c3_110, %c0_111, %c0_112], %298 {strides = array<i32>} : memref<4x8x128xf32, #tpu.memory_space<vmem>>, vector<1x7x128xf32>,
    %c0_113 = arith.constant 0 : index
    %c0_114 = arith.constant 0 : index
    %c0_115 = arith.constant 0 : index
    %300 = vector.load %arg8[%c0_113, %c0_114, %c0_115] : memref<4x8x128xf32, #tpu.memory_space<vmem>>, vector<4x8x128xf32>
    %c0_116 = arith.constant 0 : index
    %c0_117 = arith.constant 0 : index
    %c0_118 = arith.constant 0 : index
    %c0_119 = arith.constant 0 : index
    %301 = vector.load %arg7[%c0_116, %c0_117, %c0_118, %c0_119] : memref<1x4x8x128xf32, #tpu.memory_space<vmem>>, vector<1x4x8x128xf32>
    %302 = vector.shape_cast %301 : vector<1x4x8x128xf32> to vector<4x8x128xf32>
    %303 = vector.shape_cast %300 : vector<4x8x128xf32> to vector<1x4x8x128xf32>
    tpu.vector_store %arg7[%c0_116, %c0_117, %c0_118, %c0_119], %303 {strides = array<i32>} : memref<1x4x8x128xf32, #tpu.memory_space<vmem>>, vector<1x4x8x128xf32>,
    return
  }
  func.func @transform_0(%arg0: i32, %arg1: i32) -> (i32, i32, i32, i32) {
    %c0_i32 = arith.constant 0 : i32
    %c0_i32_0 = arith.constant 0 : i32
    %c0_i32_1 = arith.constant 0 : i32
    return %arg0, %arg1, %c0_i32, %c0_i32_0 : i32, i32, i32, i32
  }
  func.func @transform_1(%arg0: i32, %arg1: i32) -> (i32, i32, i32, i32) {
    %c4_i32 = arith.constant 4 : i32
    %0 = arith.muli %arg1, %c4_i32 : i32
    %c1_i32 = arith.constant 1 : i32
    %1 = arith.subi %0, %c1_i32 : i32
    %c0_i32 = arith.constant 0 : i32
    %2 = arith.maxsi %1, %c0_i32 : i32
    %c0_i32_0 = arith.constant 0 : i32
    %c0_i32_1 = arith.constant 0 : i32
    %c0_i32_2 = arith.constant 0 : i32
    return %arg0, %2, %c0_i32_0, %c0_i32_1 : i32, i32, i32, i32
  }
  func.func @transform_2(%arg0: i32, %arg1: i32) -> (i32, i32, i32, i32) {
    %c1_i32 = arith.constant 1 : i32
    %0 = arith.addi %arg1, %c1_i32 : i32
    %c4_i32 = arith.constant 4 : i32
    %1 = arith.muli %0, %c4_i32 : i32
    %c7_i32 = arith.constant 7 : i32
    %2 = arith.minsi %1, %c7_i32 : i32
    %c0_i32 = arith.constant 0 : i32
    %c0_i32_0 = arith.constant 0 : i32
    %c0_i32_1 = arith.constant 0 : i32
    return %arg0, %2, %c0_i32, %c0_i32_0 : i32, i32, i32, i32
  }
  func.func @transform_3(%arg0: i32, %arg1: i32) -> (i32, i32) {
    %c0_i32 = arith.constant 0 : i32
    %c0_i32_0 = arith.constant 0 : i32
    %c0_i32_1 = arith.constant 0 : i32
    return %c0_i32, %c0_i32_0 : i32, i32
  }
  func.func @transform_4(%arg0: i32, %arg1: i32) -> (i32, i32) {
    %c0_i32 = arith.constant 0 : i32
    %c0_i32_0 = arith.constant 0 : i32
    %c0_i32_1 = arith.constant 0 : i32
    return %c0_i32, %c0_i32_0 : i32, i32
  }
  func.func @transform_5(%arg0: i32, %arg1: i32) -> (i32, i32, i32, i32) {
    %c0_i32 = arith.constant 0 : i32
    %c0_i32_0 = arith.constant 0 : i32
    %c0_i32_1 = arith.constant 0 : i32
    return %arg0, %arg1, %c0_i32, %c0_i32_0 : i32, i32, i32, i32
  }
}

</mosaic_0001>

<bundles_post_ra>
// kernel: tile.8
= control target key start
LH: loop header
LB: loop body
LE: loop exit
PB: predicated region body
PF: predicated region fallthrough
CT: control target
= control target key end

     0   :  { %s22_s0 = inlined_call_operand.vmem [shape: f32[16], index: 0, kind: input, shape index: {}]   ;;  %s23_s1 = inlined_call_operand.vmem [shape: f32[8,16], index: 1, kind: output, shape index: {}]  }
   0x1   :  { %v4_v0 = vld [vmem:[%s22_s0] ss:$0 sm:$0xff] }
   0x2   :  { %5 = vst [vmem:[%s23_s1] sm:$0xff] %v4_v0 }

// kernel: tile.9
= control target key start
LH: loop header
LB: loop body
LE: loop exit
PB: predicated region body
PF: predicated region fallthrough
CT: control target
= control target key end

     0   :  { %s67_s10 = smov 112   ;;  %s68_s11 = smov 80   ;;  %vm3_vm0 = vcmask 130048   ;;  %vm9_vm1 = vcmask 1048448   ;;  %vm15_vm2 = vcmask 917248   ;;  %vm21_vm3 = vcmask 786048   ;;  %s111_s0 = inlined_call_operand.vmem [shape: f32[8,16], index: 0, kind: input, shape index: {}]   ;;  %s112_s1 = inlined_call_operand.vmem [shape: f32[1,128], index: 1, kind: output, shape index: {}]  }
   0x1   :  { %v53_v0 = vld [vmem:[%s111_s0 + $0x7] sm:$0x1]   ;;  %v55_v1 = vld [vmem:[%s111_s0 + $0x5] sm:$0x1]   ;;  %v54_v2 = vld [vmem:[%s111_s0 + $0x6] sm:$0x1]  }
   0x2   :  { %7 = vrot.lane.b32.xlu0 %v53_v0, %s67_s10  ;;  %19 = vrot.lane.b32.xlu1 %v55_v1, %s68_s11  ;;  %v56_v3 = vld [vmem:[%s111_s0 + $0x4] sm:$0x1]   ;;  %v2_v4 = vld [vmem:[%s111_s0] sm:$0x1]   ;;  %s69_s18 = smov 96   ;;  %s70_s19 = smov 64  }
   0x3   :  { %4 = vst.msk [vmem:[#allocation0] sm:$0x1] %vm3_vm0, %v2_v4   ;;  %v57_v5 = vld [vmem:[%s111_s0 + $0x3] sm:$0x1]   ;;  %v58_v6 = vld [vmem:[%s111_s0 + $0x2] sm:$0x1]  }
   0x4   :  { %s71_s24 = smov 48   ;;  %s72_s25 = smov 32   ;;  %v59_v7 = vld [vmem:[%s111_s0 + $0x1] sm:$0x1]   ;;  %vm27_vm4 = vcmask 654848   ;;  %vm33_vm5 = vcmask 523648  }
   0x5   :  { %s73_s0 = smov 16   ;;  %vm39_vm6 = vcmask 392448   ;;  %vm45_vm7 = vcmask 261248  }
   0x6   :  { %13 = vrot.lane.b32.xlu0 %v54_v2, %s69_s18  ;;  %25 = vrot.lane.b32.xlu1 %v56_v3, %s70_s19 }
   0xa   :  { %31 = vrot.lane.b32.xlu0 %v57_v5, %s71_s24  ;;  %37 = vrot.lane.b32.xlu1 %v58_v6, %s72_s25 }
   0xe   :  { %43 = vrot.lane.b32.xlu0 %v59_v7, %s73_s0 }
  0x74   :  { %v8_v8 = vpop.permute.xlu0 %7   ;;  %v20_v9 = vpop.permute.xlu1 %19  }
  0x75   :  { %10 = vst.msk [vmem:[#allocation0] sm:$0x1] %vm9_vm1, %v8_v8  }
  0x78   :  { %v14_v10 = vpop.permute.xlu0 %13   ;;  %v26_v11 = vpop.permute.xlu1 %25  }
  0x79   :  { %16 = vst.msk [vmem:[#allocation0] sm:$0x1] %vm15_vm2, %v14_v10  }
  0x7a   :  { %22 = vst.msk [vmem:[#allocation0] sm:$0x1] %vm21_vm3, %v20_v9  }
  0x7b   :  { %28 = vst.msk [vmem:[#allocation0] sm:$0x1] %vm27_vm4, %v26_v11  }
  0x7c   :  { %v32_v12 = vpop.permute.xlu0 %31   ;;  %v38_v13 = vpop.permute.xlu1 %37  }
  0x7d   :  { %34 = vst.msk [vmem:[#allocation0] sm:$0x1] %vm33_vm5, %v32_v12  }
  0x7e   :  { %40 = vst.msk [vmem:[#allocation0] sm:$0x1] %vm39_vm6, %v38_v13  }
  0x80   :  { %v44_v14 = vpop.permute.xlu0 %43  }
  0x81   :  { %46 = vst.msk [vmem:[#allocation0] sm:$0x1] %vm45_vm7, %v44_v14  }
  0x88   :  { %v50_v15 = vld [vmem:[#allocation0] sm:$0x1] }
  0x89   :  { %52 = vst [vmem:[%s112_s1] sm:$0x1] %v50_v15 }

// kernel: dwconv_pallas.1
= control target key start
LH: loop header
LB: loop body
LE: loop exit
PB: predicated region body
PF: predicated region fallthrough
CT: control target
= control target key end

     0   :  { %s1164_s18 = smov 0   ;;  %s1166_s19 = smov 0   ;;  %s1678_s0 = inlined_call_operand.vmem [shape: f32[2,8,8,128], index: 0, kind: input, shape index: {}, may-alias: {0,1,2}]   ;;  %s1679_s1 = inlined_call_operand.vmem [shape: f32[2,8,8,128], index: 1, kind: input, shape index: {}, may-alias: {0,1,2}]   ;;  %s1680_s2 = inlined_call_operand.vmem [shape: f32[2,8,8,128], index: 2, kind: input, shape index: {}, may-alias: {0,1,2}]   ;;  %s1681_s3 = inlined_call_operand.vmem [shape: f32[27,128], index: 3, kind: input, shape index: {}]   ;;  %s1682_s4 = inlined_call_operand.vmem [shape: f32[1,128], index: 4, kind: input, shape index: {}]   ;;  %s1683_s5 = inlined_call_operand.vmem [shape: f32[2,8,8,128], index: 5, kind: output, shape index: {}]  }
   0x1   :  { %s1168_s20 = smov 0   ;;  %s1170_s21 = smov 0  }
   0x2   :  { %s1172_s22 = smov 0  }
   0x3 LB: > { %s24_s23 = sadd.s32 1, %s1122_s20  ;;  %s27_s24 = sadd.s32 1, %s1126_s21  ;;  %s1130_s22 = sphi %s1172_s22, %s15_s22   ;;  %s1126_s21 = sphi %s1170_s21, %s1737_s21   ;;  %s1122_s20 = sphi %s1168_s20, %s1736_s20   ;;  %s1118_s19 = sphi %s1166_s19, %s1735_s19   ;;  %s1114_s18 = sphi %s1164_s18, %s1734_s18  }
   0x4   : > { %p25_p0 = scmp.ge.s32.totalorder %s24_s23, 2  ;;  %p1017_p1 = scmp.ge.s32.totalorder %s1130_s22, 1 }
   0x5   : > { %p270_p2 = scmp.lt.s32.totalorder %s1130_s22, 5 }
   0x6   : > { %s1739_s23 = smov (%p25_p0, %s24_s23), 0  ;;  %s1741_s24 = smov (!%p25_p0, %s27_s24), %s1126_s21 }
   0x7   : > { %p271_p3 = pnand %p1017_p1, %p270_p2  ;;  %p29_p4 = scmp.ge.s32.totalorder %s1741_s24, 2 }
   0x9   : > { %s1743_s24 = smov (%p29_p4, %s1741_s24), 0  ;;  %274 = sbr.rel (%p271_p3) target bundleno = 238 (0xee), region = 40 }
  0x10   : > { %s1018_s25 = sshll.u32 %s1114_s18, 2  ;;  %p331_p5 = scmp.lt.s32.totalorder %s1118_s19, 1  ;;  %v1039_v0 = vld [vmem:[%s1682_s4] ss:$0 sm:$0xff]  ;;  %v435_v5 = vlaneseq  ;;  %v1237_v9 = vld [vmem:[%s1681_s3 + $0x18] sm:$0x7] }
  0x11   : > { %p333_p6 = scmp.lt.s32.totalorder %s1018_s25, 7  ;;  %427 = vst [vmem:[#allocation2] sm:$0xff] %v1039_v0  ;;  %428 = vst [vmem:[#allocation2 + $0x8] sm:$0xff] %v1039_v0  ;;  %s1022_s6 = sadd.s32 4294967295, %s1018_s25  ;;  %v1265_v17 = vld [vmem:[%s1681_s3 + $0x8] sm:$0xff]  ;;  %v1285_v26 = vld [vmem:[%s1681_s3 + $0x10] sm:$0xff] }
  0x12   : > { %429 = vst [vmem:[#allocation2 + $0x10] sm:$0xff] %v1039_v0  ;;  %430 = vst [vmem:[#allocation2 + $0x18] sm:$0xff] %v1039_v0  ;;  %s1745_s19 = smov (!%p331_p5, %s1118_s19), 1  ;;  %p342_p7 = scmp.gt.s32.totalorder %s1022_s6, 0  ;;  %v436_v6 = vshrl.u32 %v435_v5, 7  ;;  %v1302_v34 = vld [vmem:[%s1681_s3] sm:$0xff] }
  0x13   : > { %s334_s28 = scalar_select %p333_p6, %s1018_s25, 7  ;;  %1699 = vst [vmem:[#allocation6_spill] sm:$0xff] %v1265_v17 }
  0x14   : > { %s1019_s29 = sshll.u32 %s1745_s19, 3  ;;  %s1132_s12 = smov 16   ;;  %v437_v8 = vsub.s32 1, %v436_v6  ;;  %v1260_v16 = vsub.s32 2, %v436_v6  ;;  %v1272_v21 = vsub.s32 5, %v436_v6  ;;  %v1276_v23 = vsub.s32 0, %v436_v6 }
  0x15   : > { %s336_s30 = sadd.s32 %s1019_s29, %s334_s28  ;;  %p1023_p8 = scmp.lt.s32.totalorder %s1022_s6, 7  ;;  %v1278_v24 = vsub.s32 4, %v436_v6  ;;  %v1280_v25 = vsub.s32 7, %v436_v6  ;;  %v1287_v27 = vsub.s32 3, %v436_v6  ;;  %v1297_v33 = vsub.s32 6, %v436_v6 }
  0x16   : > { %s1200_s7 = sshll.u32 %s336_s30, 3  ;;  %s1049_s13 = sadd.s32 4, %s1018_s25  ;;  %v826_v11 = vrot.slane %v1237_v9, %v437_v8  ;;  %v438_v19 = vrot.slane %v1265_v17, %v437_v8  ;;  %v446_v20 = vrot.slane %v1265_v17, %v1260_v16  ;;  %1701 = vst [vmem:[#allocation8_spill] sm:$0xff] %v1276_v23  ;;  %v584_v28 = vrot.slane %v1265_v17, %v1272_v21 }
  0x17   : > { %s338_s10 = scalar_lea.vmem %s1678_s0, %s1200_s7  ;;  %p358_p9 = scmp.lt.s32.totalorder %s1049_s13, 7  ;;  %v458_v37 = vrot.slane %v1265_v17, %v1287_v27  ;;  %v1310_v38 = vrot.slane %v1265_v17, %v1278_v24  ;;  %v1314_v39 = vrot.slane %v1265_v17, %v1280_v25  ;;  %v1318_v40 = vrot.slane %v1285_v26, %v1276_v23 }
  0x18   : > { %v1206_v1 = vld [vmem:[%s338_s10 + $0x10] sm:$0xff]  ;;  %v1208_v2 = vld [vmem:[%s338_s10] sm:$0xff]  ;;  %s343_s11 = scalar_select %p342_p7, %s1022_s6, 0  ;;  %v1214_v3 = vld [vmem:[%s338_s10 + $0x18] sm:$0xff]  ;;  %v1322_v41 = vrot.slane %v1265_v17, %v1297_v33  ;;  %v1325_v42 = vrot.slane %v1285_v26, %v437_v8  ;;  %v1329_v43 = vrot.slane %v1302_v34, %v1276_v23  ;;  %v485_v44 = vrot.slane %v1302_v34, %v437_v8 }
  0x19   : > { %1696 = vst [vmem:[#allocation3_spill] sm:$0xff] %v1208_v2  ;;  %399 = vrot.lane.b32.xlu1 %v1206_v1, %s1132_s12  ;;  %395 = vrot.lane.b32.xlu0 %v1208_v2, %s1132_s12  ;;  %v1216_v4 = vld [vmem:[%s338_s10 + $0x8] sm:$0xff]  ;;  %s1749_s13 = smov (!%p358_p9, %s1049_s13), 7  ;;  %s1133_s16 = smov 112   ;;  %v1249_v12 = vmul.f32 %v826_v11, %v1206_v1  ;;  %v1255_v14 = vmul.f32 %v826_v11, %v1214_v3  ;;  %1702 = vst [vmem:[#allocation9_spill] sm:$0xff] %v1314_v39 }
  0x1a   : > { %1697 = vst [vmem:[#allocation4_spill] sm:$0xff] %v1216_v4  ;;  %s1747_s11 = smov (!%p1023_p8, %s343_s11), 7  ;;  %s1751_s13 = smov (!%p358_p9, %s1749_s13), 7  ;;  %v1252_v13 = vmul.f32 %v826_v11, %v1216_v4  ;;  %v447_v30 = vmul.f32 %v446_v20, %v1208_v2  ;;  %v448_v35 = vmul.f32 %v446_v20, %v1216_v4  ;;  %1703 = vst [vmem:[#allocation10_spill] sm:$0xff] %v1318_v40  ;;  %v431_v59 = vld [vmem:[#allocation2 + $0x1] sm:$0x7f] }
  0x1b   : > { %s349_s14 = sadd.s32 %s1747_s11, %s1019_s29  ;;  %s365_s17 = sadd.s32 %s1019_s29, %s1751_s13  ;;  %v1334_v45 = vrot.slane %v1302_v34, %v1287_v27  ;;  %v1337_v47 = vmul.f32 %v584_v28, %v1208_v2  ;;  %v450_v48 = vmul.f32 %v446_v20, %v1214_v3  ;;  %v1346_v51 = vrot.slane %v1302_v34, %v1280_v25  ;;  %v432_v60 = vld [vmem:[#allocation2 + $0x9] sm:$0x7f] }
  0x1c   : > { %s1029_s15 = sshll.u32 %s349_s14, 3  ;;  %s1035_s27 = sshll.u32 %s365_s17, 3  ;;  %v1354_v57 = vmul.f32 %v1318_v40, %v1208_v2  ;;  %v1357_v58 = vmul.f32 %v584_v28, %v1214_v3  ;;  %v449_v61 = vmul.f32 %v446_v20, %v1206_v1  ;;  %v1361_v62 = vmul.f32 %v584_v28, %v1216_v4 }
  0x1d   : > { %401 = vrot.lane.b32.xlu1 %v1214_v3, %s1132_s12  ;;  %397 = vrot.lane.b32.xlu0 %v1216_v4, %s1132_s12  ;;  %s351_s26 = scalar_lea.vmem %s1679_s1, %s1029_s15  ;;  %s367_s6 = scalar_lea.vmem %s1680_s2, %s1035_s27  ;;  %1704 = vst [vmem:[#allocation11_spill] sm:$0xff] %v1346_v51  ;;  %v1365_v5 = vrot.slane %v1302_v34, %v1297_v33  ;;  %v1369_v6 = vmul.f32 %v1318_v40, %v1216_v4 }
  0x1e   : > { %v1229_v7 = vld [vmem:[%s351_s26] sm:$0xff]  ;;  %1705 = vst [vmem:[#allocation12_spill] sm:$0xff] %v1354_v57  ;;  %v623_v20 = vrot.slane %v1302_v34, %v1278_v24  ;;  %p382_p10 = scmp.gt.s32.totalorder %s1114_s18, 0  ;;  %v487_v17 = vmul.f32 %v485_v44, %v1216_v4  ;;  %p384_p11 = scmp.lt.s32.totalorder %s1114_s18, 1 }
  0x1f   : > { %1698 = vst [vmem:[#allocation5_spill] sm:$0xff] %v1229_v7  ;;  %v1242_v10 = vld [vmem:[%s367_s6] sm:$0xff]  ;;  %1706 = vst [vmem:[#allocation13_spill] sm:$0xff] %v1365_v5  ;;  %s380_s19 = scalar_lea.vmem %s1683_s5, %s1200_s7 }
  0x20   : > { %v1258_v15 = vmul.f32 %v826_v11, %v1242_v10  ;;  %1707 = vst [vmem:[#allocation14_spill] sm:$0xff] %v1369_v6  ;;  %v1374_v11 = vmul.f32 %v584_v28, %v1206_v1  ;;  %v1386_v28 = vmul.f32 %v1318_v40, %v1206_v1  ;;  %s383_s15 = scalar_select %p382_p10, 1.0, 0.0 }
  0x21   : > { %405 = vrot.lane.b32.xlu1 %v1216_v4, %s1133_s16  ;;  %403 = vrot.lane.b32.xlu0 %v1208_v2, %s1133_s16 }
  0x22   : > { %1708 = vst [vmem:[#allocation15_spill] sm:$0xff] %v1386_v28 }
  0x25   : > { %409 = vrot.lane.b32.xlu1 %v1214_v3, %s1133_s16  ;;  %407 = vrot.lane.b32.xlu0 %v1206_v1, %s1133_s16 }
  0x29   : > { %412 = vrot.lane.b32.xlu0 %v1229_v7, %s1132_s12  ;;  %414 = vrot.lane.b32.xlu1 %v1229_v7, %s1133_s16 }
  0x2d   : > { %417 = vrot.lane.b32.xlu0 %v1242_v10, %s1132_s12  ;;  %419 = vrot.lane.b32.xlu1 %v1242_v10, %s1133_s16  ;;  %s385_s16 = scalar_select %p384_p11, 1.0, 0.0 }
  0x8b   : > { %v1267_v18 = vpop.permute.xlu1 %399  ;;  %v1274_v22 = vpop.permute.xlu0 %395 }
  0x8c   : > { %1700 = vst [vmem:[#allocation7_spill] sm:$0xff] %v1274_v22  ;;  %v439_v29 = vmul.f32 %v438_v19, %v1274_v22  ;;  %v441_v56 = vmul.f32 %v438_v19, %v1267_v18 }
  0x8e   : > { %v451_v46 = vadd.f32 %v447_v30, %v439_v29  ;;  %v772_v29 = vmul.f32 %v1346_v51, %v1206_v1 }
  0x8f   : > { %v1293_v31 = vpop.permute.xlu1 %401  ;;  %v1295_v32 = vpop.permute.xlu0 %397 }
  0x90   : > { %v440_v36 = vmul.f32 %v438_v19, %v1295_v32  ;;  %v442_v52 = vmul.f32 %v438_v19, %v1293_v31 }
  0x92   : > { %v452_v53 = vadd.f32 %v448_v35, %v440_v36  ;;  %v454_v30 = vadd.f32 %v450_v48, %v442_v52  ;;  %v433_v48 = vld [vmem:[#allocation2 + $0x11] sm:$0x7f]  ;;  %v488_v52 = vmul.f32 %v485_v44, %v1206_v1 }
  0x93   : > { %v1340_v49 = vpop.permute.xlu1 %405  ;;  %v1342_v50 = vpop.permute.xlu0 %403 }
  0x94   : > { %v460_v54 = vmul.f32 %v458_v37, %v1340_v49  ;;  %v459_v55 = vmul.f32 %v458_v37, %v1342_v50 }
  0x96   : > { %v464_v63 = vadd.f32 %v460_v54, %v452_v53  ;;  %v463_v0 = vadd.f32 %v459_v55, %v451_v46  ;;  %v434_v53 = vld [vmem:[#allocation2 + $0x19] sm:$0x7f]  ;;  %v453_v54 = vadd.f32 %v449_v61, %v441_v56  ;;  %v486_v56 = vmul.f32 %v485_v44, %v1208_v2 }
  0x97   : > { %v1371_v8 = vpop.permute.xlu1 %409  ;;  %v1376_v19 = vpop.permute.xlu0 %407  ;;  %v1395_v61 = vmul.f32 %v623_v20, %v1216_v4 }
  0x98   : > { %v468_v35 = vadd.f32 %v464_v63, %v432_v60  ;;  %v467_v36 = vadd.f32 %v463_v0, %v431_v59  ;;  %v462_v46 = vmul.f32 %v458_v37, %v1371_v8  ;;  %v461_v55 = vmul.f32 %v458_v37, %v1376_v19 }
  0x99   : > { %v765_v59 = vmul.f32 %v1365_v5, %v1267_v18  ;;  %v1398_v37 = vmul.f32 %v623_v20, %v1206_v1  ;;  %v532_v0 = vrot.slane %v1285_v26, %v1287_v27  ;;  %v495_v5 = vrot.slane %v1302_v34, %v1260_v16 }
  0x9a   : > { %471 = vst [vmem:[#allocation2 + $0x1] sm:$0x7f] %v467_v36  ;;  %472 = vst [vmem:[#allocation2 + $0x9] sm:$0x7f] %v468_v35  ;;  %v466_v51 = vadd.f32 %v462_v46, %v454_v30  ;;  %v465_v60 = vadd.f32 %v461_v55, %v453_v54  ;;  %v504_v35 = vmul.f32 %v485_v44, %v1229_v7 }
  0x9b   : > { %1709 = vst [vmem:[#allocation16_spill] sm:$0xff] %v1398_v37  ;;  %v1400_v63 = vpop.permute.xlu0 %412  ;;  %v1405_v36 = vadd.f32 %v772_v29, %v765_v59  ;;  %v1408_v46 = vmul.f32 %v623_v20, %v1208_v2  ;;  %v668_v27 = vrot.slane %v1285_v26, %v1297_v33  ;;  %v479_v44 = vmul.f32 %v1329_v43, %v1274_v22 }
  0x9c   : > { %v470_v30 = vadd.f32 %v466_v51, %v434_v53  ;;  %v469_v54 = vadd.f32 %v465_v60, %v433_v48  ;;  %v503_v55 = vmul.f32 %v1329_v43, %v1400_v63  ;;  %v481_v51 = vmul.f32 %v1329_v43, %v1267_v18 }
  0x9d   : > { %1710 = vst [vmem:[#allocation17_spill] sm:$0xff] %v1405_v36  ;;  %1711 = vst [vmem:[#allocation18_spill] sm:$0xff] %v1408_v46  ;;  %v1424_v29 = vrot.slane %v1285_v26, %v1260_v16  ;;  %v1428_v53 = vrot.slane %v1285_v26, %v1272_v21  ;;  %v480_v33 = vmul.f32 %v1329_v43, %v1295_v32  ;;  %v1451_v43 = vpop.permute.xlu1 %414 }
  0x9e   : > { %474 = vst [vmem:[#allocation2 + $0x19] sm:$0x7f] %v470_v30  ;;  %473 = vst [vmem:[#allocation2 + $0x11] sm:$0x7f] %v469_v54  ;;  %v1433_v48 = vmul.f32 %v623_v20, %v1229_v7  ;;  %v1436_v59 = vmul.f32 %v532_v0, %v1206_v1  ;;  %v1439_v60 = vmul.f32 %v532_v0, %v1214_v3  ;;  %v1441_v30 = vstv %s383_s15 }
  0x9f   : > { %v1445_v36 = vrot.slane %v1285_v26, %v1278_v24  ;;  %v1449_v54 = vrot.slane %v1302_v34, %v1272_v21  ;;  %v1454_v20 = vmul.f32 %v532_v0, %v1216_v4  ;;  %v505_v2 = vadd.f32 %v504_v35, %v503_v55 }
  0xa0   : > { %v497_v7 = vmul.f32 %v495_v5, %v1340_v49  ;;  %v1459_v57 = vmul.f32 %v668_v27, %v1206_v1  ;;  %v819_v24 = vrot.slane %v1237_v9, %v1276_v23  ;;  %v491_v28 = vadd.f32 %v488_v52, %v481_v51 }
  0xa1   : > { %v489_v6 = vadd.f32 %v486_v56, %v479_v44  ;;  %v496_v21 = vmul.f32 %v495_v5, %v1342_v50  ;;  %v498_v34 = vmul.f32 %v495_v5, %v1376_v19  ;;  %v490_v40 = vadd.f32 %v487_v17, %v480_v33  ;;  %v513_v46 = vld [vmem:[#allocation2 + $0x9] sm:$0x7f] }
  0xa2   : > { %1712 = vst [vmem:[#allocation19_spill] sm:$0xff] %v1459_v57  ;;  %v506_v37 = vmul.f32 %v495_v5, %v1451_v43  ;;  %v1467_v35 = vmul.f32 %v668_v27, %v1216_v4  ;;  %v1470_v55 = vmul.f32 %v668_v27, %v1214_v3  ;;  %v1476_v52 = vrot.slane %v1285_v26, %v1280_v25 }
  0xa3   : > { %v499_v1 = vadd.f32 %v496_v21, %v489_v6  ;;  %v501_v57 = vadd.f32 %v498_v34, %v491_v28  ;;  %v1480_v17 = vrot.slane %v1237_v9, %v1260_v16  ;;  %v579_v5 = vmul.f32 %v1310_v38, %v1267_v18 }
  0xa4   : > { %v577_v56 = vmul.f32 %v1310_v38, %v1274_v22  ;;  %v500_v51 = vadd.f32 %v497_v7, %v490_v40  ;;  %v507_v6 = vadd.f32 %v506_v37, %v505_v2  ;;  %v561_v34 = vmul.f32 %v532_v0, %v1242_v10  ;;  %v502_v40 = vld [vmem:[#allocation2 + $0x1] sm:$0x7f] }
  0xa5   : > { %v515_v44 = vld [vmem:[#allocation2 + $0x19] sm:$0x7f]  ;;  %v514_v28 = vld [vmem:[#allocation2 + $0x11] sm:$0x7f]  ;;  %v516_v33 = vadd.f32 %v513_v46, %v499_v1  ;;  %v1488_v25 = vmul.f32 %v668_v27, %v1242_v10  ;;  %v580_v9 = vmul.f32 %v1310_v38, %v1293_v31  ;;  %v578_v16 = vmul.f32 %v1310_v38, %v1295_v32 }
  0xa6   : > { %v518_v21 = vadd.f32 %v515_v44, %v501_v57  ;;  %v509_v26 = vmul.f32 %v1441_v30, %v507_v6  ;;  %v517_v4 = vadd.f32 %v514_v28, %v500_v51  ;;  %v1497_v2 = vmul.f32 %v1314_v39, %v1267_v18 }
  0xa7   : > { %v1501_v7 = vmul.f32 %v1314_v39, %v1274_v22  ;;  %v527_v10 = vmul.f32 %v1424_v29, %v1267_v18  ;;  %519 = vst [vmem:[#allocation2 + $0x9] sm:$0x7f] %v516_v33  ;;  %v1505_v57 = vstv %s385_s16  ;;  %v1508_v38 = vadd.f32 %v1337_v47, %v577_v56 }
  0xa8   : > { %1713 = vst [vmem:[#allocation20_spill] sm:$0xff] %v1497_v2  ;;  %521 = vst [vmem:[#allocation2 + $0x19] sm:$0x7f] %v518_v21  ;;  %v1511_v37 = vadd.f32 %v1374_v11, %v579_v5  ;;  %v528_v0 = vmul.f32 %v1424_v29, %v1293_v31  ;;  %v510_v46 = vadd.f32 %v509_v26, %v502_v40  ;;  %v418_v11 = vpop.permute.xlu0 %417 }
  0xa9   : > { %1714 = vst [vmem:[#allocation21_spill] sm:$0xff] %v1501_v7  ;;  %520 = vst [vmem:[#allocation2 + $0x11] sm:$0x7f] %v517_v4  ;;  %v1517_v27 = vmul.f32 %v1314_v39, %v1295_v32  ;;  %v617_v1 = vmul.f32 %v1334_v45, %v1274_v22  ;;  %v526_v44 = vmul.f32 %v1424_v29, %v1295_v32 }
  0xaa   : > { %v544_v47 = vmul.f32 %v1445_v36, %v1376_v19  ;;  %v1526_v5 = vadd.f32 %v1357_v58, %v580_v9  ;;  %v590_v56 = vadd.f32 %v1361_v62, %v578_v16  ;;  %v618_v4 = vmul.f32 %v1334_v45, %v1295_v32  ;;  %511 = vst [vmem:[#allocation2 + $0x1] sm:$0x7f] %v510_v46 }
  0xab   : > { %v545_v51 = vmul.f32 %v1445_v36, %v1371_v8  ;;  %v1535_v6 = vmul.f32 %v1334_v45, %v1267_v18  ;;  %v537_v28 = vadd.f32 %v1436_v59, %v527_v10  ;;  %v543_v33 = vmul.f32 %v1445_v36, %v1340_v49  ;;  %v420_v59 = vpop.permute.xlu1 %419 }
  0xac   : > { %v820_v58 = vmul.f32 %v819_v24, %v1295_v32  ;;  %v538_v62 = vadd.f32 %v1439_v60, %v528_v0  ;;  %v821_v21 = vmul.f32 %v819_v24, %v1267_v18  ;;  %v822_v9 = vmul.f32 %v819_v24, %v1293_v31 }
  0xad   : > { %v560_v16 = vmul.f32 %v1424_v29, %v418_v11  ;;  %v536_v26 = vadd.f32 %v1454_v20, %v526_v44  ;;  %v547_v40 = vadd.f32 %v544_v47, %v537_v28  ;;  %v862_v22 = vmul.f32 %v819_v24, %v418_v11 }
  0xae   : > { %v830_v46 = vadd.f32 %v1252_v13, %v820_v58  ;;  %v548_v10 = vadd.f32 %v545_v51, %v538_v62  ;;  %v550_v23 = vld [vmem:[#allocation2 + $0x9] sm:$0x7f]  ;;  %v831_v39 = vadd.f32 %v1249_v12, %v821_v21  ;;  %v832_v7 = vadd.f32 %v1255_v14, %v822_v9 }
  0xaf   : > { %v562_v60 = vadd.f32 %v561_v34, %v560_v16  ;;  %v598_v0 = vmul.f32 %v1322_v41, %v1340_v49  ;;  %v641_v29 = vmul.f32 %v1334_v45, %v1400_v63  ;;  %v546_v2 = vadd.f32 %v543_v33, %v536_v26  ;;  %v559_v9 = vld [vmem:[#allocation2 + $0x19] sm:$0x7f] }
  0xb0   : > { %v551_v20 = vld [vmem:[#allocation2 + $0x11] sm:$0x7f]  ;;  %v553_v44 = vadd.f32 %v550_v23, %v547_v40  ;;  %v837_v13 = vmul.f32 %v1480_v17, %v1340_v49  ;;  %v839_v24 = vmul.f32 %v1480_v17, %v1371_v8  ;;  %v563_v12 = vmul.f32 %v1445_v36, %v420_v59 }
  0xb1   : > { %v554_v47 = vadd.f32 %v551_v20, %v548_v10  ;;  %v1560_v14 = vmul.f32 %v1325_v42, %v1340_v49  ;;  %v597_v34 = vmul.f32 %v1322_v41, %v1342_v50  ;;  %v628_v45 = vadd.f32 %v1395_v61, %v618_v4  ;;  %v549_v51 = vld [vmem:[#allocation2 + $0x1] sm:$0x7f] }
  0xb2   : > { %556 = vst [vmem:[#allocation2 + $0x9] sm:$0x7f] %v553_v44  ;;  %v864_v23 = vadd.f32 %v1258_v15, %v862_v22  ;;  %v552_v28 = vadd.f32 %v549_v51, %v546_v2  ;;  %v1566_v33 = vadd.f32 %v839_v24, %v832_v7  ;;  %v564_v58 = vadd.f32 %v563_v12, %v562_v60  ;;  %v1716_v12 = vld [vmem:[#allocation19_spill] sm:$0xff] }
  0xb3   : > { %557 = vst [vmem:[#allocation2 + $0x11] sm:$0x7f] %v554_v47  ;;  %v838_v36 = vmul.f32 %v1480_v17, %v1376_v19  ;;  %v643_v62 = vadd.f32 %v1433_v48, %v641_v29  ;;  %v644_v21 = vmul.f32 %v1449_v54, %v1451_v43  ;;  %v1573_v16 = vadd.f32 %v837_v13, %v830_v46  ;;  %v1715_v46 = vld [vmem:[#allocation18_spill] sm:$0xff] }
  0xb4   : > { %v865_v61 = vmul.f32 %v1480_v17, %v420_v59  ;;  %v599_v15 = vmul.f32 %v1322_v41, %v1376_v19  ;;  %555 = vst [vmem:[#allocation2 + $0x1] sm:$0x7f] %v552_v28  ;;  %v634_v22 = vmul.f32 %v1449_v54, %v1342_v50  ;;  %v566_v2 = vmul.f32 %v1505_v57, %v564_v58 }
  0xb5   : > { %v1581_v7 = vadd.f32 %v838_v36, %v831_v39  ;;  %v635_v48 = vmul.f32 %v1449_v54, %v1340_v49  ;;  %v663_v4 = vmul.f32 %v1428_v53, %v1267_v18  ;;  %v664_v17 = vmul.f32 %v1428_v53, %v1293_v31 }
  0xb6   : > { %v1589_v26 = vadd.f32 %v865_v61, %v864_v23  ;;  %v602_v40 = vadd.f32 %v598_v0, %v590_v56  ;;  %v627_v10 = vadd.f32 %v1715_v46, %v617_v1  ;;  %v695_v60 = vmul.f32 %v1428_v53, %v418_v11  ;;  %v1719_v46 = vld [vmem:[#allocation14_spill] sm:$0xff] }
  0xb7   : > { %v567_v29 = vadd.f32 %v566_v2, %v559_v9  ;;  %v601_v39 = vadd.f32 %v597_v34, %v1508_v38  ;;  %v600_v20 = vmul.f32 %v1322_v41, %v1371_v8  ;;  %v645_v44 = vadd.f32 %v644_v21, %v643_v62 }
  0xb8   : > { %v680_v18 = vmul.f32 %v1476_v52, %v1376_v19  ;;  %v603_v47 = vadd.f32 %v599_v15, %v1511_v37  ;;  %v637_v24 = vadd.f32 %v634_v22, %v627_v10  ;;  %v662_v56 = vmul.f32 %v1428_v53, %v1295_v32  ;;  %v1720_v10 = vld [vmem:[#allocation20_spill] sm:$0xff] }
  0xb9   : > { %v570_v13 = vld [vmem:[#allocation2 + $0x8] sm:$0xff]  ;;  %v681_v1 = vmul.f32 %v1476_v52, %v1371_v8  ;;  %568 = vst [vmem:[#allocation2 + $0x19] sm:$0x7f] %v567_v29  ;;  %v638_v0 = vadd.f32 %v635_v48, %v628_v45  ;;  %v673_v41 = vadd.f32 %v1716_v12, %v663_v4  ;;  %v674_v34 = vadd.f32 %v1470_v55, %v664_v17  ;;  %v1718_v17 = vld [vmem:[#allocation10_spill] sm:$0xff] }
  0xba   : > { %v571_v11 = vld [vmem:[#allocation2 + $0x10] sm:$0xff]  ;;  %v606_v38 = vadd.f32 %v602_v40, %v570_v13  ;;  %v697_v23 = vadd.f32 %v1488_v25, %v695_v60  ;;  %v679_v37 = vmul.f32 %v1476_v52, %v1340_v49  ;;  %v698_v28 = vmul.f32 %v1476_v52, %v420_v59  ;;  %v1717_v52 = vld [vmem:[#allocation16_spill] sm:$0xff]  ;;  %v1721_v60 = vld [vmem:[#allocation15_spill] sm:$0xff] }
  0xbb   : > { %v607_v51 = vadd.f32 %v603_v47, %v571_v11  ;;  %v569_v53 = vld [vmem:[#allocation2] sm:$0xff]  ;;  %v636_v58 = vmul.f32 %v1449_v54, %v1376_v19  ;;  %v646_v36 = vmul.f32 %v645_v44, %v1441_v30  ;;  %v683_v45 = vadd.f32 %v680_v18, %v673_v41  ;;  %v1722_v18 = vld [vmem:[#allocation21_spill] sm:$0xff]  ;;  %v1723_v47 = vld [vmem:[#allocation12_spill] sm:$0xff] }
  0xbc   : > { %v652_v62 = vadd.f32 %v637_v24, %v606_v38  ;;  %v605_v21 = vadd.f32 %v601_v39, %v569_v53  ;;  %v672_v55 = vadd.f32 %v1467_v35, %v662_v56  ;;  %v684_v61 = vadd.f32 %v681_v1, %v674_v34  ;;  %v1725_v56 = vld [vmem:[#allocation5_spill] sm:$0xff]  ;;  %v1726_v1 = vld [vmem:[#allocation11_spill] sm:$0xff]  ;;  %v1730_v53 = vld [vmem:[#allocation4_spill] sm:$0xff] }
  0xbd   : > { %v653_v9 = vadd.f32 %v638_v0, %v607_v51  ;;  %v604_v25 = vadd.f32 %v600_v20, %v1526_v5  ;;  %v733_v15 = vmul.f32 %v1325_v42, %v1376_v19  ;;  %v629_v59 = vadd.f32 %v1717_v52, %v1535_v6  ;;  %v1727_v0 = vld [vmem:[#allocation13_spill] sm:$0xff]  ;;  %v1728_v51 = vld [vmem:[#allocation8_spill] sm:$0xff] }
  0xbe   : > { %v689_v22 = vadd.f32 %v683_v45, %v652_v62  ;;  %v647_v2 = vadd.f32 %v646_v36, %v605_v21  ;;  %v682_v54 = vadd.f32 %v679_v37, %v672_v55  ;;  %v699_v4 = vadd.f32 %v698_v28, %v697_v23  ;;  %v1729_v23 = vld [vmem:[#allocation6_spill] sm:$0xff]  ;;  %v1731_v45 = vld [vmem:[#allocation7_spill] sm:$0xff] }
  0xbf   : > { %v690_v48 = vadd.f32 %v684_v61, %v653_v9  ;;  %v722_v40 = vmul.f32 %v1718_v17, %v1214_v3  ;;  %v724_v35 = vadd.f32 %v1719_v46, %v1517_v27  ;;  %v725_v5 = vadd.f32 %v1721_v60, %v1720_v10  ;;  %v1724_v3 = vld [vmem:[#allocation9_spill] sm:$0xff]  ;;  %v1732_v21 = vld [vmem:[#allocation3_spill] sm:$0xff] }
  0xc0   : > { %v572_v29 = vld [vmem:[#allocation2 + $0x18] sm:$0xff]  ;;  %692 = vst [vmem:[#allocation2 + $0x8] sm:$0xff] %v689_v22  ;;  %v731_v39 = vmul.f32 %v1325_v42, %v1342_v50  ;;  %v639_v6 = vadd.f32 %v636_v58, %v629_v59  ;;  %v688_v44 = vadd.f32 %v682_v54, %v647_v2  ;;  %v723_v13 = vadd.f32 %v1723_v47, %v1722_v18  ;;  %v1733_v18 = vld [vmem:[#allocation17_spill] sm:$0xff] }
  0xc1   : > { %v608_v20 = vadd.f32 %v604_v25, %v572_v29  ;;  %693 = vst [vmem:[#allocation2 + $0x10] sm:$0xff] %v690_v48  ;;  %v714_v24 = vmul.f32 %v1724_v3, %v1293_v31  ;;  %v736_v27 = vadd.f32 %v1560_v14, %v724_v35  ;;  %v788_v11 = vmul.f32 %v1726_v1, %v1725_v56 }
  0xc2   : > { %v737_v38 = vadd.f32 %v733_v15, %v725_v5  ;;  %v787_v12 = vmul.f32 %v1727_v0, %v1400_v63  ;;  %691 = vst [vmem:[#allocation2] sm:$0xff] %v688_v44  ;;  %v700_v34 = vmul.f32 %v699_v4, %v1505_v57  ;;  %v779_v37 = vrot.slane %v1729_v23, %v1728_v51 }
  0xc3   : > { %v654_v41 = vadd.f32 %v639_v6, %v608_v20  ;;  %v735_v28 = vadd.f32 %v731_v39, %v723_v13  ;;  %v734_v31 = vmul.f32 %v1325_v42, %v1371_v8  ;;  %v771_v14 = vmul.f32 %v1726_v1, %v1730_v53 }
  0xc4   : > { %v726_v36 = vadd.f32 %v722_v40, %v714_v24  ;;  %v744_v62 = vrot.slane %v736_v27, 1  ;;  %v763_v63 = vmul.f32 %v1727_v0, %v1731_v45  ;;  %v770_v9 = vmul.f32 %v1726_v1, %v1732_v21 }
  0xc5   : > { %v701_v58 = vadd.f32 %v700_v34, %v654_v41  ;;  %v745_v55 = vrot.slane %v737_v38, 1  ;;  %v764_v61 = vmul.f32 %v1727_v0, %v1295_v32  ;;  %v789_v25 = vadd.f32 %v788_v11, %v787_v12 }
  0xc6   : > { %v790_v15 = vmul.f32 %v779_v37, %v1451_v43  ;;  %v780_v8 = vmul.f32 %v779_v37, %v1342_v50  ;;  %v743_v22 = vrot.slane %v735_v28, 1  ;;  %v738_v2 = vadd.f32 %v734_v31, %v726_v36 }
  0xc7   : > { %702 = vst [vmem:[#allocation2 + $0x18] sm:$0xff] %v701_v58  ;;  %v704_v42 = vld [vmem:[#allocation2 + $0x8] sm:$0x7f]  ;;  %v781_v54 = vmul.f32 %v779_v37, %v1340_v49  ;;  %v773_v4 = vadd.f32 %v770_v9, %v763_v63  ;;  %v774_v40 = vadd.f32 %v771_v14, %v764_v61  ;;  %v782_v50 = vmul.f32 %v779_v37, %v1376_v19 }
  0xc8   : > { %v705_v52 = vld [vmem:[#allocation2 + $0x10] sm:$0x7f]  ;;  %v752_v59 = vadd.f32 %v744_v62, %v704_v42  ;;  %v791_v46 = vadd.f32 %v790_v15, %v789_v25  ;;  %v746_v43 = vrot.slane %v738_v2, 1  ;;  %v851_v11 = vrot.slane %v1566_v33, 1 }
  0xc9   : > { %v753_v48 = vadd.f32 %v745_v55, %v705_v52  ;;  %v703_v17 = vld [vmem:[#allocation2] sm:$0x7f]  ;;  %v783_v35 = vadd.f32 %v780_v8, %v773_v4  ;;  %v784_v10 = vadd.f32 %v781_v54, %v774_v40  ;;  %v785_v47 = vadd.f32 %v782_v50, %v1733_v18 }
  0xca   : > { %756 = vst [vmem:[#allocation2 + $0x8] sm:$0x7f] %v752_v59  ;;  %v751_v32 = vadd.f32 %v743_v22, %v703_v17  ;;  %v792_v5 = vmul.f32 %v791_v46, %v1441_v30  ;;  %v850_v30 = vrot.slane %v1581_v7, 1  ;;  %v849_v41 = vrot.slane %v1573_v16, 1 }
  0xcb   : > { %757 = vst [vmem:[#allocation2 + $0x10] sm:$0x7f] %v753_v48  ;;  %v804_v39 = vrot.slane %v783_v35, 1  ;;  %v805_v49 = vrot.slane %v784_v10, 1  ;;  %v806_v56 = vrot.slane %v785_v47, 1  ;;  %v867_v51 = vmul.f32 %v1589_v26, %v1505_v57 }
  0xcc   : > { %755 = vst [vmem:[#allocation2] sm:$0x7f] %v751_v32  ;;  %v794_v13 = vrot.slane %v792_v5, 1 }
  0xcd   : > { %v869_v28 = vrot.slane %v867_v51, 1 }
  0xce   : > { %v706_v60 = vld [vmem:[#allocation2 + $0x18] sm:$0x7f] }
  0xcf   : > { %v754_v29 = vadd.f32 %v746_v43, %v706_v60 }
  0xd1   : > { %758 = vst [vmem:[#allocation2 + $0x18] sm:$0x7f] %v754_v29  ;;  %v798_v6 = vld [vmem:[#allocation2 + $0x8] sm:$0x7f] }
  0xd2   : > { %v799_v20 = vld [vmem:[#allocation2 + $0x10] sm:$0x7f]  ;;  %v810_v44 = vadd.f32 %v804_v39, %v798_v6 }
  0xd3   : > { %v811_v3 = vadd.f32 %v805_v49, %v799_v20  ;;  %v786_v24 = vld [vmem:[#allocation2] sm:$0x7f] }
  0xd4   : > { %813 = vst [vmem:[#allocation2 + $0x8] sm:$0x7f] %v810_v44  ;;  %v796_v27 = vadd.f32 %v794_v13, %v786_v24 }
  0xd5   : > { %814 = vst [vmem:[#allocation2 + $0x10] sm:$0x7f] %v811_v3 }
  0xd6   : > { %797 = vst [vmem:[#allocation2] sm:$0x7f] %v796_v27 }
  0xd8   : > { %v800_v19 = vld [vmem:[#allocation2 + $0x18] sm:$0x7f] }
  0xd9   : > { %v812_v1 = vadd.f32 %v806_v56, %v800_v19 }
  0xdb   : > { %815 = vst [vmem:[#allocation2 + $0x18] sm:$0x7f] %v812_v1  ;;  %v844_v38 = vld [vmem:[#allocation2 + $0x8] sm:$0x7f] }
  0xdc   : > { %v845_v0 = vld [vmem:[#allocation2 + $0x10] sm:$0x7f]  ;;  %v856_v12 = vadd.f32 %v850_v30, %v844_v38 }
  0xdd   : > { %v857_v34 = vadd.f32 %v851_v11, %v845_v0  ;;  %v843_v23 = vld [vmem:[#allocation2] sm:$0x7f] }
  0xde   : > { %859 = vst [vmem:[#allocation2 + $0x8] sm:$0x7f] %v856_v12  ;;  %v855_v37 = vadd.f32 %v849_v41, %v843_v23 }
  0xdf   : > { %860 = vst [vmem:[#allocation2 + $0x10] sm:$0x7f] %v857_v34 }
  0xe0   : > { %858 = vst [vmem:[#allocation2] sm:$0x7f] %v855_v37 }
  0xe2   : > { %v861_v7 = vld [vmem:[#allocation2 + $0x18] sm:$0x7f] }
  0xe3   : > { %v871_v33 = vadd.f32 %v869_v28, %v861_v7 }
  0xe5   : > { %872 = vst [vmem:[#allocation2 + $0x18] sm:$0x7f] %v871_v33  ;;  %v874_v31 = vld [vmem:[#allocation2 + $0x8] sm:$0xff] }
  0xe6   : > { %v875_v53 = vld [vmem:[#allocation2 + $0x10] sm:$0xff]  ;;  %878 = vst [vmem:[%s380_s19 + $0x8] sm:$0xff] %v874_v31 }
  0xe7   : > { %879 = vst [vmem:[%s380_s19 + $0x10] sm:$0xff] %v875_v53  ;;  %v873_v16 = vld [vmem:[#allocation2] sm:$0xff] }
  0xe8   : > { %877 = vst [vmem:[%s380_s19] sm:$0xff] %v873_v16 }
  0xec   : > { %v876_v57 = vld [vmem:[#allocation2 + $0x18] sm:$0xff] }
  0xed   : > { %880 = vst [vmem:[%s380_s19 + $0x18] sm:$0xff] %v876_v57 }
  0xee PF: > { %s15_s22 = sadd.s32 1, %s1130_s22   ;;  %s1734_s18 = smov %s1122_s20 }
  0xef   : > { %p12_p12 = scmp.ge.s32.totalorder %s15_s22, 6   ;;  %s1735_s19 = smov %s1126_s21 }
  0xf0   : > { %s1736_s20 = smov %s1739_s23  ;;  %s1737_s21 = smov %s1743_s24 }
  0xf1   :  { %14 = sbr.rel (!%p12_p12) target bundleno = 3 (0x3), region = 78 }

</bundles_post_ra>
